<compile_context>
chip_gen: v6e
topology: v6e:2x2x1
jax: 0.10.0
libtpu: 0.0.40
codegen_flags: <defaults>
</compile_context>

<pallas_src>
import functools

import jax
import jax.numpy as jnp
from jax import lax
from jax.experimental import pallas as pl
from jax.experimental.pallas import tpu as pltpu

HIDDEN = 32
LAYERS = 2
VOCAB = 16


def _bigru_kernel(gi_f_ref, gi_b_ref, mask_ref, h0_ref, whh_ref, bhh_ref,
                  out_ref, hlast_ref, *, hidden):
    """Fused fwd+bwd GRU recurrence for one layer; whole sequence stays in VMEM.

    gi_*_ref : (T, B, 3H)  precomputed input projections (x @ W_ih + b_ih)
    mask_ref : (T, B, 1)   validity mask (pack_padded_sequence semantics)
    h0_ref   : (B, 2H)     [h0_fwd | h0_bwd]
    whh_ref  : (2H, 6H)    block-diagonal [[W_hh_f, 0], [0, W_hh_b]]
    bhh_ref  : (1, 6H)     [b_hh_f | b_hh_b]
    out_ref  : (T, B, 2H)  per-step outputs [fwd | bwd]; zero at padded steps
    hlast_ref: (B, 2H)     final hidden of both directions (written once)
    """
    T = gi_f_ref.shape[0]
    H = hidden
    whh = whh_ref[...]        # hoisted: loaded once, reused every step
    bhh = bhh_ref[...]

    def gru_cell(gi, gh, h):
        # PyTorch GRU gate order (r, z, n); r gates the hidden n-contribution.
        r = jax.nn.sigmoid(gi[:, :H] + gh[:, :H])
        z = jax.nn.sigmoid(gi[:, H:2 * H] + gh[:, H:2 * H])
        n = jnp.tanh(gi[:, 2 * H:] + r * gh[:, 2 * H:])
        return (1.0 - z) * n + z * h

    def step(t, h):
        tb = T - 1 - t                      # backward direction walks time reversed
        h_f, h_b = h[:, :H], h[:, H:]
        # One (B, 2H) x (2H, 6H) MXU push covers both directions' hidden gates.
        gh = jnp.dot(h, whh, preferred_element_type=jnp.float32) + bhh
        hf_new = gru_cell(gi_f_ref[t], gh[:, :3 * H], h_f)
        hb_new = gru_cell(gi_b_ref[tb], gh[:, 3 * H:], h_b)
        m_f = mask_ref[t]                   # (B, 1)
        m_b = mask_ref[tb]
        # Packed-sequence semantics: padded steps output 0 and freeze h.
        out_ref[t, :, :H] = m_f * hf_new
        out_ref[tb, :, H:] = m_b * hb_new
        h_f_next = m_f * hf_new + (1.0 - m_f) * h_f
        h_b_next = m_b * hb_new + (1.0 - m_b) * h_b
        return jnp.concatenate([h_f_next, h_b_next], axis=-1)

    h_final = lax.fori_loop(0, T, step, h0_ref[...], unroll=True)
    hlast_ref[...] = h_final                # single store of the final hidden


def _bigru_layer(x, mask, h0_f, h0_b, params_f, params_b):
    """One bidirectional GRU layer. x: (T, B, Din) -> ((T, B, 2H), h_f, h_b)."""
    T, B, _ = x.shape
    wih_f, whh_f, bih_f, bhh_f = params_f
    wih_b, whh_b, bih_b, bhh_b = params_b
    H = whh_f.shape[0]

    # Hoist the input projection off the serial critical path: one batched
    # (T*B, Din) x (Din, 3H) matmul per direction instead of T tiny ones.
    gi_f = jnp.einsum('tbd,dg->tbg', x, wih_f) + bih_f        # (T, B, 3H)
    gi_b = jnp.einsum('tbd,dg->tbg', x, wih_b) + bih_b        # (T, B, 3H)

    # Block-diagonal recurrent weight so both directions share one MXU push.
    whh_blk = jnp.zeros((2 * H, 6 * H), jnp.float32)
    whh_blk = whh_blk.at[:H, :3 * H].set(whh_f)
    whh_blk = whh_blk.at[H:, 3 * H:].set(whh_b)
    bhh_cat = jnp.concatenate([bhh_f, bhh_b], axis=-1)        # (1, 6H)
    h0_cat = jnp.concatenate([h0_f, h0_b], axis=-1)           # (B, 2H)

    out, h_last = pl.pallas_call(
        functools.partial(_bigru_kernel, hidden=H),
        out_shape=(
            jax.ShapeDtypeStruct((T, B, 2 * H), jnp.float32),
            jax.ShapeDtypeStruct((B, 2 * H), jnp.float32),
        ),
        compiler_params=pltpu.CompilerParams(vmem_limit_bytes=16 * 1024 * 1024),
    )(gi_f, gi_b, mask, h0_cat, whh_blk, bhh_cat)
    return out, h_last[:, :H], h_last[:, H:]


# ----------------------------- pure-JAX reference ----------------------------

def _gru_direction_ref(x, mask, h0, wih, whh, bih, bhh):
    T = x.shape[0]
    H = h0.shape[-1]
    h = h0
    outs = []
    for t in range(T):
        gi = x[t] @ wih + bih
        gh = h @ whh + bhh
        r = jax.nn.sigmoid(gi[:, :H] + gh[:, :H])
        z = jax.nn.sigmoid(gi[:, H:2 * H] + gh[:, H:2 * H])
        n = jnp.tanh(gi[:, 2 * H:] + r * gh[:, 2 * H:])
        h_new = (1.0 - z) * n + z * h
        m = mask[t]
        h = m * h_new + (1.0 - m) * h
        outs.append(m * h_new)
    return jnp.stack(outs, axis=0), h


def _bigru_layer_ref(x, mask, h0_f, h0_b, params_f, params_b):
    out_f, h_f = _gru_direction_ref(x, mask, h0_f, *params_f)
    out_b_r, h_b = _gru_direction_ref(x[::-1], mask[::-1], h0_b, *params_b)
    out = jnp.concatenate([out_f, out_b_r[::-1]], axis=-1)
    return out, h_f, h_b


# --------------------------------- model glue ---------------------------------

def init_params(key, hidden=HIDDEN, layers=LAYERS, vocab=VOCAB):
    """Deterministic parameter init (PyTorch-style uniform(-1/sqrt(H), 1/sqrt(H)))."""
    k = 1.0 / jnp.sqrt(hidden)
    keys = jax.random.split(key, 1 + 4 * 2 * layers)
    embedding = jax.random.normal(keys[0], (vocab, hidden), jnp.float32) * 0.1
    params = {}
    idx = 1
    for l in range(layers):
        din = hidden if l == 0 else 2 * hidden
        for d in range(2):  # 0 = forward, 1 = backward
            wih = jax.random.uniform(keys[idx], (din, 3 * hidden), jnp.float32, -k, k); idx += 1
            whh = jax.random.uniform(keys[idx], (hidden, 3 * hidden), jnp.float32, -k, k); idx += 1
            bih = jax.random.uniform(keys[idx], (1, 3 * hidden), jnp.float32, -k, k); idx += 1
            bhh = jax.random.uniform(keys[idx], (1, 3 * hidden), jnp.float32, -k, k); idx += 1
            params[(l, d)] = (wih, whh, bih, bhh)
    return embedding, params


def encoder_forward(input_seq, input_lengths, embedding, params,
                    hidden=None, num_layers=LAYERS, hidden_dim=HIDDEN,
                    layer_fn=_bigru_layer):
    """Full EncoderRNN.forward: embedding -> stacked bi-GRU (packed) -> sum halves."""
    T, B = input_seq.shape
    embedded = jnp.take(embedding, input_seq, axis=0)                       # (T, B, H)
    mask = (jnp.arange(T)[:, None] < input_lengths[None, :])
    mask = mask.astype(jnp.float32)[:, :, None]                             # (T, B, 1)

    if hidden is None:
        hidden = jnp.zeros((2 * num_layers, B, hidden_dim), jnp.float32)

    x = embedded
    finals = []
    for l in range(num_layers):
        x, h_f, h_b = layer_fn(x, mask, hidden[2 * l], hidden[2 * l + 1],
                               params[(l, 0)], params[(l, 1)])
        finals.extend([h_f, h_b])

    h_n = jnp.stack(finals, axis=0)                                         # (2L, B, H)
    outputs = x[:, :, :hidden_dim] + x[:, :, hidden_dim:]                   # (T, B, H)
    return outputs, h_n


if __name__ == "__main__":
    key = jax.random.PRNGKey(0)
    k_emb, k_seq = jax.random.split(key)

    T, B = 8, 4
    embedding, params = init_params(k_emb)

    input_seq = jax.random.randint(k_seq, (T, B), 0, VOCAB, dtype=jnp.int32)
    # pack_padded_sequence expects lengths sorted in decreasing order.
    input_lengths = jnp.array([8, 6, 5, 3], dtype=jnp.int32)
    # Zero out padded token positions (cosmetic; kernel masks them anyway).
    valid = (jnp.arange(T)[:, None] < input_lengths[None, :])
    input_seq = jnp.where(valid, input_seq, 0)

    fwd = jax.jit(encoder_forward)
    outputs, h_n = fwd(input_seq, input_lengths, embedding, params)
    outputs = jax.block_until_ready(outputs)
    h_n = jax.block_until_ready(h_n)

    # Cross-check against a pure-JAX reference of the same semantics.
    ref_fwd = jax.jit(functools.partial(encoder_forward, layer_fn=_bigru_layer_ref))
    outputs_ref, h_n_ref = ref_fwd(input_seq, input_lengths, embedding, params)
    outputs_ref = jax.block_until_ready(outputs_ref)

    assert outputs.shape == (T, B, HIDDEN)
    assert h_n.shape == (2 * LAYERS, B, HIDDEN)
    assert jnp.allclose(outputs, outputs_ref, atol=1e-4, rtol=1e-4)
    assert jnp.allclose(h_n, h_n_ref, atol=1e-4, rtol=1e-4)

    print("KERNEL_OK")
</pallas_src>

<mosaic_0001>
module attributes {stable_mosaic.version = 11 : i64} {
  func.func @_bigru_kernel(%arg0: memref<8x4x96xf32, #tpu.memory_space<vmem>>, %arg1: memref<8x4x96xf32, #tpu.memory_space<vmem>>, %arg2: memref<8x4x1xf32, #tpu.memory_space<vmem>>, %arg3: memref<4x64xf32, #tpu.memory_space<vmem>>, %arg4: memref<64x192xf32, #tpu.memory_space<vmem>>, %arg5: memref<1x192xf32, #tpu.memory_space<vmem>>, %arg6: memref<8x4x64xf32, #tpu.memory_space<vmem>>, %arg7: memref<4x64xf32, #tpu.memory_space<vmem>>) attributes {dimension_semantics = [], scalar_prefetch = 0 : i64, scratch_operands = 0 : i64, tpu.core_type = #tpu.core_type<tc>} {
    %c0 = arith.constant 0 : index
    %c0_0 = arith.constant 0 : index
    %0 = vector.load %arg4[%c0, %c0_0] : memref<64x192xf32, #tpu.memory_space<vmem>>, vector<64x192xf32>
    %c0_1 = arith.constant 0 : index
    %c0_2 = arith.constant 0 : index
    %1 = vector.load %arg5[%c0_1, %c0_2] : memref<1x192xf32, #tpu.memory_space<vmem>>, vector<1x192xf32>
    %c0_3 = arith.constant 0 : index
    %c0_4 = arith.constant 0 : index
    %2 = vector.load %arg3[%c0_3, %c0_4] : memref<4x64xf32, #tpu.memory_space<vmem>>, vector<4x64xf32>
    %c0_i32 = arith.constant 0 : i32
    %c7_i32 = arith.constant 7 : i32
    %3 = arith.subi %c7_i32, %c0_i32 : i32
    %4 = vector.extract_strided_slice %2 {offsets = [0, 0], sizes = [4, 32], strides = [1, 1]} : vector<4x64xf32> to vector<4x32xf32>
    %5 = vector.extract_strided_slice %2 {offsets = [0, 32], sizes = [4, 32], strides = [1, 1]} : vector<4x64xf32> to vector<4x32xf32>
    %cst = arith.constant dense<0.000000e+00> : vector<4x192xf32>
    %6 = tpu.matmul %2, %0, %cst {dimension_numbers = #tpu.dot_dimension_numbers<[1], [0], [0], [1], [0, 0, 1, 1], [], []>} : vector<4x64xf32>, vector<64x192xf32>, vector<4x192xf32> -> vector<4x192xf32>
    %7 = vector.broadcast %1 : vector<1x192xf32> to vector<4x192xf32>
    %8 = arith.addf %6, %7 : vector<4x192xf32>
    %9 = arith.index_cast %c0_i32 : i32 to index
    %c0_5 = arith.constant 0 : index
    %c0_6 = arith.constant 0 : index
    %10 = vector.load %arg0[%9, %c0_5, %c0_6] : memref<8x4x96xf32, #tpu.memory_space<vmem>>, vector<1x4x96xf32>
    %11 = vector.shape_cast %10 : vector<1x4x96xf32> to vector<4x96xf32>
    %12 = vector.extract_strided_slice %8 {offsets = [0, 0], sizes = [4, 96], strides = [1, 1]} : vector<4x192xf32> to vector<4x96xf32>
    %13 = vector.extract_strided_slice %11 {offsets = [0, 0], sizes = [4, 32], strides = [1, 1]} : vector<4x96xf32> to vector<4x32xf32>
    %14 = vector.extract_strided_slice %12 {offsets = [0, 0], sizes = [4, 32], strides = [1, 1]} : vector<4x96xf32> to vector<4x32xf32>
    %15 = arith.addf %13, %14 : vector<4x32xf32>
    %16 = arith.negf %15 : vector<4x32xf32>
    %17 = math.exp %16 : vector<4x32xf32>
    %cst_7 = arith.constant 1.000000e+00 : f32
    %18 = vector.broadcast %cst_7 : f32 to vector<4x32xf32>
    %19 = arith.addf %18, %17 : vector<4x32xf32>
    %20 = arith.divf %18, %19 : vector<4x32xf32>
    %21 = vector.extract_strided_slice %11 {offsets = [0, 32], sizes = [4, 32], strides = [1, 1]} : vector<4x96xf32> to vector<4x32xf32>
    %22 = vector.extract_strided_slice %12 {offsets = [0, 32], sizes = [4, 32], strides = [1, 1]} : vector<4x96xf32> to vector<4x32xf32>
    %23 = arith.addf %21, %22 : vector<4x32xf32>
    %24 = arith.negf %23 : vector<4x32xf32>
    %25 = math.exp %24 : vector<4x32xf32>
    %cst_8 = arith.constant 1.000000e+00 : f32
    %26 = vector.broadcast %cst_8 : f32 to vector<4x32xf32>
    %27 = arith.addf %26, %25 : vector<4x32xf32>
    %28 = arith.divf %26, %27 : vector<4x32xf32>
    %29 = vector.extract_strided_slice %11 {offsets = [0, 64], sizes = [4, 32], strides = [1, 1]} : vector<4x96xf32> to vector<4x32xf32>
    %30 = vector.extract_strided_slice %12 {offsets = [0, 64], sizes = [4, 32], strides = [1, 1]} : vector<4x96xf32> to vector<4x32xf32>
    %31 = arith.mulf %20, %30 : vector<4x32xf32>
    %32 = arith.addf %29, %31 : vector<4x32xf32>
    %33 = math.tanh %32 : vector<4x32xf32>
    %cst_9 = arith.constant 1.000000e+00 : f32
    %34 = vector.broadcast %cst_9 : f32 to vector<4x32xf32>
    %35 = arith.subf %34, %28 : vector<4x32xf32>
    %36 = arith.mulf %35, %33 : vector<4x32xf32>
    %37 = arith.mulf %28, %4 : vector<4x32xf32>
    %38 = arith.addf %36, %37 : vector<4x32xf32>
    %39 = arith.index_cast %3 : i32 to index
    %c0_10 = arith.constant 0 : index
    %c0_11 = arith.constant 0 : index
    %40 = vector.load %arg1[%39, %c0_10, %c0_11] : memref<8x4x96xf32, #tpu.memory_space<vmem>>, vector<1x4x96xf32>
    %41 = vector.shape_cast %40 : vector<1x4x96xf32> to vector<4x96xf32>
    %42 = vector.extract_strided_slice %8 {offsets = [0, 96], sizes = [4, 96], strides = [1, 1]} : vector<4x192xf32> to vector<4x96xf32>
    %43 = vector.extract_strided_slice %41 {offsets = [0, 0], sizes = [4, 32], strides = [1, 1]} : vector<4x96xf32> to vector<4x32xf32>
    %44 = vector.extract_strided_slice %42 {offsets = [0, 0], sizes = [4, 32], strides = [1, 1]} : vector<4x96xf32> to vector<4x32xf32>
    %45 = arith.addf %43, %44 : vector<4x32xf32>
    %46 = arith.negf %45 : vector<4x32xf32>
    %47 = math.exp %46 : vector<4x32xf32>
    %cst_12 = arith.constant 1.000000e+00 : f32
    %48 = vector.broadcast %cst_12 : f32 to vector<4x32xf32>
    %49 = arith.addf %48, %47 : vector<4x32xf32>
    %50 = arith.divf %48, %49 : vector<4x32xf32>
    %51 = vector.extract_strided_slice %41 {offsets = [0, 32], sizes = [4, 32], strides = [1, 1]} : vector<4x96xf32> to vector<4x32xf32>
    %52 = vector.extract_strided_slice %42 {offsets = [0, 32], sizes = [4, 32], strides = [1, 1]} : vector<4x96xf32> to vector<4x32xf32>
    %53 = arith.addf %51, %52 : vector<4x32xf32>
    %54 = arith.negf %53 : vector<4x32xf32>
    %55 = math.exp %54 : vector<4x32xf32>
    %cst_13 = arith.constant 1.000000e+00 : f32
    %56 = vector.broadcast %cst_13 : f32 to vector<4x32xf32>
    %57 = arith.addf %56, %55 : vector<4x32xf32>
    %58 = arith.divf %56, %57 : vector<4x32xf32>
    %59 = vector.extract_strided_slice %41 {offsets = [0, 64], sizes = [4, 32], strides = [1, 1]} : vector<4x96xf32> to vector<4x32xf32>
    %60 = vector.extract_strided_slice %42 {offsets = [0, 64], sizes = [4, 32], strides = [1, 1]} : vector<4x96xf32> to vector<4x32xf32>
    %61 = arith.mulf %50, %60 : vector<4x32xf32>
    %62 = arith.addf %59, %61 : vector<4x32xf32>
    %63 = math.tanh %62 : vector<4x32xf32>
    %cst_14 = arith.constant 1.000000e+00 : f32
    %64 = vector.broadcast %cst_14 : f32 to vector<4x32xf32>
    %65 = arith.subf %64, %58 : vector<4x32xf32>
    %66 = arith.mulf %65, %63 : vector<4x32xf32>
    %67 = arith.mulf %58, %5 : vector<4x32xf32>
    %68 = arith.addf %66, %67 : vector<4x32xf32>
    %69 = arith.index_cast %c0_i32 : i32 to index
    %c0_15 = arith.constant 0 : index
    %c0_16 = arith.constant 0 : index
    %70 = vector.load %arg2[%69, %c0_15, %c0_16] : memref<8x4x1xf32, #tpu.memory_space<vmem>>, vector<1x4x1xf32>
    %71 = vector.shape_cast %70 : vector<1x4x1xf32> to vector<4x1xf32>
    %72 = arith.index_cast %3 : i32 to index
    %c0_17 = arith.constant 0 : index
    %c0_18 = arith.constant 0 : index
    %73 = vector.load %arg2[%72, %c0_17, %c0_18] : memref<8x4x1xf32, #tpu.memory_space<vmem>>, vector<1x4x1xf32>
    %74 = vector.shape_cast %73 : vector<1x4x1xf32> to vector<4x1xf32>
    %75 = vector.broadcast %71 : vector<4x1xf32> to vector<4x32xf32>
    %76 = arith.mulf %75, %38 : vector<4x32xf32>
    %77 = arith.index_cast %c0_i32 : i32 to index
    %c0_19 = arith.constant 0 : index
    %c0_20 = arith.constant 0 : index
    %78 = vector.load %arg6[%77, %c0_19, %c0_20] : memref<8x4x64xf32, #tpu.memory_space<vmem>>, vector<1x4x32xf32>
    %79 = vector.shape_cast %78 : vector<1x4x32xf32> to vector<4x32xf32>
    %80 = vector.shape_cast %76 : vector<4x32xf32> to vector<1x4x32xf32>
    tpu.vector_store %arg6[%77, %c0_19, %c0_20], %80 {strides = array<i32>} : memref<8x4x64xf32, #tpu.memory_space<vmem>>, vector<1x4x32xf32>,
    %81 = vector.broadcast %74 : vector<4x1xf32> to vector<4x32xf32>
    %82 = arith.mulf %81, %68 : vector<4x32xf32>
    %83 = arith.index_cast %3 : i32 to index
    %c0_21 = arith.constant 0 : index
    %c32 = arith.constant 32 : index
    %84 = vector.load %arg6[%83, %c0_21, %c32] : memref<8x4x64xf32, #tpu.memory_space<vmem>>, vector<1x4x32xf32>
    %85 = vector.shape_cast %84 : vector<1x4x32xf32> to vector<4x32xf32>
    %86 = vector.shape_cast %82 : vector<4x32xf32> to vector<1x4x32xf32>
    tpu.vector_store %arg6[%83, %c0_21, %c32], %86 {strides = array<i32>} : memref<8x4x64xf32, #tpu.memory_space<vmem>>, vector<1x4x32xf32>,
    %87 = vector.broadcast %71 : vector<4x1xf32> to vector<4x32xf32>
    %88 = arith.mulf %87, %38 : vector<4x32xf32>
    %cst_22 = arith.constant 1.000000e+00 : f32
    %89 = vector.broadcast %cst_22 : f32 to vector<4x1xf32>
    %90 = arith.subf %89, %71 : vector<4x1xf32>
    %91 = vector.broadcast %90 : vector<4x1xf32> to vector<4x32xf32>
    %92 = arith.mulf %91, %4 : vector<4x32xf32>
    %93 = arith.addf %88, %92 : vector<4x32xf32>
    %94 = vector.broadcast %74 : vector<4x1xf32> to vector<4x32xf32>
    %95 = arith.mulf %94, %68 : vector<4x32xf32>
    %cst_23 = arith.constant 1.000000e+00 : f32
    %96 = vector.broadcast %cst_23 : f32 to vector<4x1xf32>
    %97 = arith.subf %96, %74 : vector<4x1xf32>
    %98 = vector.broadcast %97 : vector<4x1xf32> to vector<4x32xf32>
    %99 = arith.mulf %98, %5 : vector<4x32xf32>
    %100 = arith.addf %95, %99 : vector<4x32xf32>
    %101 = tpu.concatenate %93, %100 in 1 : vector<4x32xf32>, vector<4x32xf32> -> vector<4x64xf32>
    %c1_i32 = arith.constant 1 : i32
    %c7_i32_24 = arith.constant 7 : i32
    %102 = arith.subi %c7_i32_24, %c1_i32 : i32
    %103 = vector.extract_strided_slice %101 {offsets = [0, 0], sizes = [4, 32], strides = [1, 1]} : vector<4x64xf32> to vector<4x32xf32>
    %104 = vector.extract_strided_slice %101 {offsets = [0, 32], sizes = [4, 32], strides = [1, 1]} : vector<4x64xf32> to vector<4x32xf32>
    %cst_25 = arith.constant dense<0.000000e+00> : vector<4x192xf32>
    %105 = tpu.matmul %101, %0, %cst_25 {dimension_numbers = #tpu.dot_dimension_numbers<[1], [0], [0], [1], [0, 0, 1, 1], [], []>} : vector<4x64xf32>, vector<64x192xf32>, vector<4x192xf32> -> vector<4x192xf32>
    %106 = vector.broadcast %1 : vector<1x192xf32> to vector<4x192xf32>
    %107 = arith.addf %105, %106 : vector<4x192xf32>
    %108 = arith.index_cast %c1_i32 : i32 to index
    %c0_26 = arith.constant 0 : index
    %c0_27 = arith.constant 0 : index
    %109 = vector.load %arg0[%108, %c0_26, %c0_27] : memref<8x4x96xf32, #tpu.memory_space<vmem>>, vector<1x4x96xf32>
    %110 = vector.shape_cast %109 : vector<1x4x96xf32> to vector<4x96xf32>
    %111 = vector.extract_strided_slice %107 {offsets = [0, 0], sizes = [4, 96], strides = [1, 1]} : vector<4x192xf32> to vector<4x96xf32>
    %112 = vector.extract_strided_slice %110 {offsets = [0, 0], sizes = [4, 32], strides = [1, 1]} : vector<4x96xf32> to vector<4x32xf32>
    %113 = vector.extract_strided_slice %111 {offsets = [0, 0], sizes = [4, 32], strides = [1, 1]} : vector<4x96xf32> to vector<4x32xf32>
    %114 = arith.addf %112, %113 : vector<4x32xf32>
    %115 = arith.negf %114 : vector<4x32xf32>
    %116 = math.exp %115 : vector<4x32xf32>
    %cst_28 = arith.constant 1.000000e+00 : f32
    %117 = vector.broadcast %cst_28 : f32 to vector<4x32xf32>
    %118 = arith.addf %117, %116 : vector<4x32xf32>
    %119 = arith.divf %117, %118 : vector<4x32xf32>
    %120 = vector.extract_strided_slice %110 {offsets = [0, 32], sizes = [4, 32], strides = [1, 1]} : vector<4x96xf32> to vector<4x32xf32>
    %121 = vector.extract_strided_slice %111 {offsets = [0, 32], sizes = [4, 32], strides = [1, 1]} : vector<4x96xf32> to vector<4x32xf32>
    %122 = arith.addf %120, %121 : vector<4x32xf32>
    %123 = arith.negf %122 : vector<4x32xf32>
    %124 = math.exp %123 : vector<4x32xf32>
    %cst_29 = arith.constant 1.000000e+00 : f32
    %125 = vector.broadcast %cst_29 : f32 to vector<4x32xf32>
    %126 = arith.addf %125, %124 : vector<4x32xf32>
    %127 = arith.divf %125, %126 : vector<4x32xf32>
    %128 = vector.extract_strided_slice %110 {offsets = [0, 64], sizes = [4, 32], strides = [1, 1]} : vector<4x96xf32> to vector<4x32xf32>
    %129 = vector.extract_strided_slice %111 {offsets = [0, 64], sizes = [4, 32], strides = [1, 1]} : vector<4x96xf32> to vector<4x32xf32>
    %130 = arith.mulf %119, %129 : vector<4x32xf32>
    %131 = arith.addf %128, %130 : vector<4x32xf32>
    %132 = math.tanh %131 : vector<4x32xf32>
    %cst_30 = arith.constant 1.000000e+00 : f32
    %133 = vector.broadcast %cst_30 : f32 to vector<4x32xf32>
    %134 = arith.subf %133, %127 : vector<4x32xf32>
    %135 = arith.mulf %134, %132 : vector<4x32xf32>
    %136 = arith.mulf %127, %103 : vector<4x32xf32>
    %137 = arith.addf %135, %136 : vector<4x32xf32>
    %138 = arith.index_cast %102 : i32 to index
    %c0_31 = arith.constant 0 : index
    %c0_32 = arith.constant 0 : index
    %139 = vector.load %arg1[%138, %c0_31, %c0_32] : memref<8x4x96xf32, #tpu.memory_space<vmem>>, vector<1x4x96xf32>
    %140 = vector.shape_cast %139 : vector<1x4x96xf32> to vector<4x96xf32>
    %141 = vector.extract_strided_slice %107 {offsets = [0, 96], sizes = [4, 96], strides = [1, 1]} : vector<4x192xf32> to vector<4x96xf32>
    %142 = vector.extract_strided_slice %140 {offsets = [0, 0], sizes = [4, 32], strides = [1, 1]} : vector<4x96xf32> to vector<4x32xf32>
    %143 = vector.extract_strided_slice %141 {offsets = [0, 0], sizes = [4, 32], strides = [1, 1]} : vector<4x96xf32> to vector<4x32xf32>
    %144 = arith.addf %142, %143 : vector<4x32xf32>
    %145 = arith.negf %144 : vector<4x32xf32>
    %146 = math.exp %145 : vector<4x32xf32>
    %cst_33 = arith.constant 1.000000e+00 : f32
    %147 = vector.broadcast %cst_33 : f32 to vector<4x32xf32>
    %148 = arith.addf %147, %146 : vector<4x32xf32>
    %149 = arith.divf %147, %148 : vector<4x32xf32>
    %150 = vector.extract_strided_slice %140 {offsets = [0, 32], sizes = [4, 32], strides = [1, 1]} : vector<4x96xf32> to vector<4x32xf32>
    %151 = vector.extract_strided_slice %141 {offsets = [0, 32], sizes = [4, 32], strides = [1, 1]} : vector<4x96xf32> to vector<4x32xf32>
    %152 = arith.addf %150, %151 : vector<4x32xf32>
    %153 = arith.negf %152 : vector<4x32xf32>
    %154 = math.exp %153 : vector<4x32xf32>
    %cst_34 = arith.constant 1.000000e+00 : f32
    %155 = vector.broadcast %cst_34 : f32 to vector<4x32xf32>
    %156 = arith.addf %155, %154 : vector<4x32xf32>
    %157 = arith.divf %155, %156 : vector<4x32xf32>
    %158 = vector.extract_strided_slice %140 {offsets = [0, 64], sizes = [4, 32], strides = [1, 1]} : vector<4x96xf32> to vector<4x32xf32>
    %159 = vector.extract_strided_slice %141 {offsets = [0, 64], sizes = [4, 32], strides = [1, 1]} : vector<4x96xf32> to vector<4x32xf32>
    %160 = arith.mulf %149, %159 : vector<4x32xf32>
    %161 = arith.addf %158, %160 : vector<4x32xf32>
    %162 = math.tanh %161 : vector<4x32xf32>
    %cst_35 = arith.constant 1.000000e+00 : f32
    %163 = vector.broadcast %cst_35 : f32 to vector<4x32xf32>
    %164 = arith.subf %163, %157 : vector<4x32xf32>
    %165 = arith.mulf %164, %162 : vector<4x32xf32>
    %166 = arith.mulf %157, %104 : vector<4x32xf32>
    %167 = arith.addf %165, %166 : vector<4x32xf32>
    %168 = arith.index_cast %c1_i32 : i32 to index
    %c0_36 = arith.constant 0 : index
    %c0_37 = arith.constant 0 : index
    %169 = vector.load %arg2[%168, %c0_36, %c0_37] : memref<8x4x1xf32, #tpu.memory_space<vmem>>, vector<1x4x1xf32>
    %170 = vector.shape_cast %169 : vector<1x4x1xf32> to vector<4x1xf32>
    %171 = arith.index_cast %102 : i32 to index
    %c0_38 = arith.constant 0 : index
    %c0_39 = arith.constant 0 : index
    %172 = vector.load %arg2[%171, %c0_38, %c0_39] : memref<8x4x1xf32, #tpu.memory_space<vmem>>, vector<1x4x1xf32>
    %173 = vector.shape_cast %172 : vector<1x4x1xf32> to vector<4x1xf32>
    %174 = vector.broadcast %170 : vector<4x1xf32> to vector<4x32xf32>
    %175 = arith.mulf %174, %137 : vector<4x32xf32>
    %176 = arith.index_cast %c1_i32 : i32 to index
    %c0_40 = arith.constant 0 : index
    %c0_41 = arith.constant 0 : index
    %177 = vector.load %arg6[%176, %c0_40, %c0_41] : memref<8x4x64xf32, #tpu.memory_space<vmem>>, vector<1x4x32xf32>
    %178 = vector.shape_cast %177 : vector<1x4x32xf32> to vector<4x32xf32>
    %179 = vector.shape_cast %175 : vector<4x32xf32> to vector<1x4x32xf32>
    tpu.vector_store %arg6[%176, %c0_40, %c0_41], %179 {strides = array<i32>} : memref<8x4x64xf32, #tpu.memory_space<vmem>>, vector<1x4x32xf32>,
    %180 = vector.broadcast %173 : vector<4x1xf32> to vector<4x32xf32>
    %181 = arith.mulf %180, %167 : vector<4x32xf32>
    %182 = arith.index_cast %102 : i32 to index
    %c0_42 = arith.constant 0 : index
    %c32_43 = arith.constant 32 : index
    %183 = vector.load %arg6[%182, %c0_42, %c32_43] : memref<8x4x64xf32, #tpu.memory_space<vmem>>, vector<1x4x32xf32>
    %184 = vector.shape_cast %183 : vector<1x4x32xf32> to vector<4x32xf32>
    %185 = vector.shape_cast %181 : vector<4x32xf32> to vector<1x4x32xf32>
    tpu.vector_store %arg6[%182, %c0_42, %c32_43], %185 {strides = array<i32>} : memref<8x4x64xf32, #tpu.memory_space<vmem>>, vector<1x4x32xf32>,
    %186 = vector.broadcast %170 : vector<4x1xf32> to vector<4x32xf32>
    %187 = arith.mulf %186, %137 : vector<4x32xf32>
    %cst_44 = arith.constant 1.000000e+00 : f32
    %188 = vector.broadcast %cst_44 : f32 to vector<4x1xf32>
    %189 = arith.subf %188, %170 : vector<4x1xf32>
    %190 = vector.broadcast %189 : vector<4x1xf32> to vector<4x32xf32>
    %191 = arith.mulf %190, %103 : vector<4x32xf32>
    %192 = arith.addf %187, %191 : vector<4x32xf32>
    %193 = vector.broadcast %173 : vector<4x1xf32> to vector<4x32xf32>
    %194 = arith.mulf %193, %167 : vector<4x32xf32>
    %cst_45 = arith.constant 1.000000e+00 : f32
    %195 = vector.broadcast %cst_45 : f32 to vector<4x1xf32>
    %196 = arith.subf %195, %173 : vector<4x1xf32>
    %197 = vector.broadcast %196 : vector<4x1xf32> to vector<4x32xf32>
    %198 = arith.mulf %197, %104 : vector<4x32xf32>
    %199 = arith.addf %194, %198 : vector<4x32xf32>
    %200 = tpu.concatenate %192, %199 in 1 : vector<4x32xf32>, vector<4x32xf32> -> vector<4x64xf32>
    %c2_i32 = arith.constant 2 : i32
    %c7_i32_46 = arith.constant 7 : i32
    %201 = arith.subi %c7_i32_46, %c2_i32 : i32
    %202 = vector.extract_strided_slice %200 {offsets = [0, 0], sizes = [4, 32], strides = [1, 1]} : vector<4x64xf32> to vector<4x32xf32>
    %203 = vector.extract_strided_slice %200 {offsets = [0, 32], sizes = [4, 32], strides = [1, 1]} : vector<4x64xf32> to vector<4x32xf32>
    %cst_47 = arith.constant dense<0.000000e+00> : vector<4x192xf32>
    %204 = tpu.matmul %200, %0, %cst_47 {dimension_numbers = #tpu.dot_dimension_numbers<[1], [0], [0], [1], [0, 0, 1, 1], [], []>} : vector<4x64xf32>, vector<64x192xf32>, vector<4x192xf32> -> vector<4x192xf32>
    %205 = vector.broadcast %1 : vector<1x192xf32> to vector<4x192xf32>
    %206 = arith.addf %204, %205 : vector<4x192xf32>
    %207 = arith.index_cast %c2_i32 : i32 to index
    %c0_48 = arith.constant 0 : index
    %c0_49 = arith.constant 0 : index
    %208 = vector.load %arg0[%207, %c0_48, %c0_49] : memref<8x4x96xf32, #tpu.memory_space<vmem>>, vector<1x4x96xf32>
    %209 = vector.shape_cast %208 : vector<1x4x96xf32> to vector<4x96xf32>
    %210 = vector.extract_strided_slice %206 {offsets = [0, 0], sizes = [4, 96], strides = [1, 1]} : vector<4x192xf32> to vector<4x96xf32>
    %211 = vector.extract_strided_slice %209 {offsets = [0, 0], sizes = [4, 32], strides = [1, 1]} : vector<4x96xf32> to vector<4x32xf32>
    %212 = vector.extract_strided_slice %210 {offsets = [0, 0], sizes = [4, 32], strides = [1, 1]} : vector<4x96xf32> to vector<4x32xf32>
    %213 = arith.addf %211, %212 : vector<4x32xf32>
    %214 = arith.negf %213 : vector<4x32xf32>
    %215 = math.exp %214 : vector<4x32xf32>
    %cst_50 = arith.constant 1.000000e+00 : f32
    %216 = vector.broadcast %cst_50 : f32 to vector<4x32xf32>
    %217 = arith.addf %216, %215 : vector<4x32xf32>
    %218 = arith.divf %216, %217 : vector<4x32xf32>
    %219 = vector.extract_strided_slice %209 {offsets = [0, 32], sizes = [4, 32], strides = [1, 1]} : vector<4x96xf32> to vector<4x32xf32>
    %220 = vector.extract_strided_slice %210 {offsets = [0, 32], sizes = [4, 32], strides = [1, 1]} : vector<4x96xf32> to vector<4x32xf32>
    %221 = arith.addf %219, %220 : vector<4x32xf32>
    %222 = arith.negf %221 : vector<4x32xf32>
    %223 = math.exp %222 : vector<4x32xf32>
    %cst_51 = arith.constant 1.000000e+00 : f32
    %224 = vector.broadcast %cst_51 : f32 to vector<4x32xf32>
    %225 = arith.addf %224, %223 : vector<4x32xf32>
    %226 = arith.divf %224, %225 : vector<4x32xf32>
    %227 = vector.extract_strided_slice %209 {offsets = [0, 64], sizes = [4, 32], strides = [1, 1]} : vector<4x96xf32> to vector<4x32xf32>
    %228 = vector.extract_strided_slice %210 {offsets = [0, 64], sizes = [4, 32], strides = [1, 1]} : vector<4x96xf32> to vector<4x32xf32>
    %229 = arith.mulf %218, %228 : vector<4x32xf32>
    %230 = arith.addf %227, %229 : vector<4x32xf32>
    %231 = math.tanh %230 : vector<4x32xf32>
    %cst_52 = arith.constant 1.000000e+00 : f32
    %232 = vector.broadcast %cst_52 : f32 to vector<4x32xf32>
    %233 = arith.subf %232, %226 : vector<4x32xf32>
    %234 = arith.mulf %233, %231 : vector<4x32xf32>
    %235 = arith.mulf %226, %202 : vector<4x32xf32>
    %236 = arith.addf %234, %235 : vector<4x32xf32>
    %237 = arith.index_cast %201 : i32 to index
    %c0_53 = arith.constant 0 : index
    %c0_54 = arith.constant 0 : index
    %238 = vector.load %arg1[%237, %c0_53, %c0_54] : memref<8x4x96xf32, #tpu.memory_space<vmem>>, vector<1x4x96xf32>
    %239 = vector.shape_cast %238 : vector<1x4x96xf32> to vector<4x96xf32>
    %240 = vector.extract_strided_slice %206 {offsets = [0, 96], sizes = [4, 96], strides = [1, 1]} : vector<4x192xf32> to vector<4x96xf32>
    %241 = vector.extract_strided_slice %239 {offsets = [0, 0], sizes = [4, 32], strides = [1, 1]} : vector<4x96xf32> to vector<4x32xf32>
    %242 = vector.extract_strided_slice %240 {offsets = [0, 0], sizes = [4, 32], strides = [1, 1]} : vector<4x96xf32> to vector<4x32xf32>
    %243 = arith.addf %241, %242 : vector<4x32xf32>
    %244 = arith.negf %243 : vector<4x32xf32>
    %245 = math.exp %244 : vector<4x32xf32>
    %cst_55 = arith.constant 1.000000e+00 : f32
    %246 = vector.broadcast %cst_55 : f32 to vector<4x32xf32>
    %247 = arith.addf %246, %245 : vector<4x32xf32>
    %248 = arith.divf %246, %247 : vector<4x32xf32>
    %249 = vector.extract_strided_slice %239 {offsets = [0, 32], sizes = [4, 32], strides = [1, 1]} : vector<4x96xf32> to vector<4x32xf32>
    %250 = vector.extract_strided_slice %240 {offsets = [0, 32], sizes = [4, 32], strides = [1, 1]} : vector<4x96xf32> to vector<4x32xf32>
    %251 = arith.addf %249, %250 : vector<4x32xf32>
    %252 = arith.negf %251 : vector<4x32xf32>
    %253 = math.exp %252 : vector<4x32xf32>
    %cst_56 = arith.constant 1.000000e+00 : f32
    %254 = vector.broadcast %cst_56 : f32 to vector<4x32xf32>
    %255 = arith.addf %254, %253 : vector<4x32xf32>
    %256 = arith.divf %254, %255 : vector<4x32xf32>
    %257 = vector.extract_strided_slice %239 {offsets = [0, 64], sizes = [4, 32], strides = [1, 1]} : vector<4x96xf32> to vector<4x32xf32>
    %258 = vector.extract_strided_slice %240 {offsets = [0, 64], sizes = [4, 32], strides = [1, 1]} : vector<4x96xf32> to vector<4x32xf32>
    %259 = arith.mulf %248, %258 : vector<4x32xf32>
    %260 = arith.addf %257, %259 : vector<4x32xf32>
    %261 = math.tanh %260 : vector<4x32xf32>
    %cst_57 = arith.constant 1.000000e+00 : f32
    %262 = vector.broadcast %cst_57 : f32 to vector<4x32xf32>
    %263 = arith.subf %262, %256 : vector<4x32xf32>
    %264 = arith.mulf %263, %261 : vector<4x32xf32>
    %265 = arith.mulf %256, %203 : vector<4x32xf32>
    %266 = arith.addf %264, %265 : vector<4x32xf32>
    %267 = arith.index_cast %c2_i32 : i32 to index
    %c0_58 = arith.constant 0 : index
    %c0_59 = arith.constant 0 : index
    %268 = vector.load %arg2[%267, %c0_58, %c0_59] : memref<8x4x1xf32, #tpu.memory_space<vmem>>, vector<1x4x1xf32>
    %269 = vector.shape_cast %268 : vector<1x4x1xf32> to vector<4x1xf32>
    %270 = arith.index_cast %201 : i32 to index
    %c0_60 = arith.constant 0 : index
    %c0_61 = arith.constant 0 : index
    %271 = vector.load %arg2[%270, %c0_60, %c0_61] : memref<8x4x1xf32, #tpu.memory_space<vmem>>, vector<1x4x1xf32>
    %272 = vector.shape_cast %271 : vector<1x4x1xf32> to vector<4x1xf32>
    %273 = vector.broadcast %269 : vector<4x1xf32> to vector<4x32xf32>
    %274 = arith.mulf %273, %236 : vector<4x32xf32>
    %275 = arith.index_cast %c2_i32 : i32 to index
    %c0_62 = arith.constant 0 : index
    %c0_63 = arith.constant 0 : index
    %276 = vector.load %arg6[%275, %c0_62, %c0_63] : memref<8x4x64xf32, #tpu.memory_space<vmem>>, vector<1x4x32xf32>
    %277 = vector.shape_cast %276 : vector<1x4x32xf32> to vector<4x32xf32>
    %278 = vector.shape_cast %274 : vector<4x32xf32> to vector<1x4x32xf32>
    tpu.vector_store %arg6[%275, %c0_62, %c0_63], %278 {strides = array<i32>} : memref<8x4x64xf32, #tpu.memory_space<vmem>>, vector<1x4x32xf32>,
    %279 = vector.broadcast %272 : vector<4x1xf32> to vector<4x32xf32>
    %280 = arith.mulf %279, %266 : vector<4x32xf32>
    %281 = arith.index_cast %201 : i32 to index
    %c0_64 = arith.constant 0 : index
    %c32_65 = arith.constant 32 : index
    %282 = vector.load %arg6[%281, %c0_64, %c32_65] : memref<8x4x64xf32, #tpu.memory_space<vmem>>, vector<1x4x32xf32>
    %283 = vector.shape_cast %282 : vector<1x4x32xf32> to vector<4x32xf32>
    %284 = vector.shape_cast %280 : vector<4x32xf32> to vector<1x4x32xf32>
    tpu.vector_store %arg6[%281, %c0_64, %c32_65], %284 {strides = array<i32>} : memref<8x4x64xf32, #tpu.memory_space<vmem>>, vector<1x4x32xf32>,
    %285 = vector.broadcast %269 : vector<4x1xf32> to vector<4x32xf32>
    %286 = arith.mulf %285, %236 : vector<4x32xf32>
    %cst_66 = arith.constant 1.000000e+00 : f32
    %287 = vector.broadcast %cst_66 : f32 to vector<4x1xf32>
    %288 = arith.subf %287, %269 : vector<4x1xf32>
    %289 = vector.broadcast %288 : vector<4x1xf32> to vector<4x32xf32>
    %290 = arith.mulf %289, %202 : vector<4x32xf32>
    %291 = arith.addf %286, %290 : vector<4x32xf32>
    %292 = vector.broadcast %272 : vector<4x1xf32> to vector<4x32xf32>
    %293 = arith.mulf %292, %266 : vector<4x32xf32>
    %cst_67 = arith.constant 1.000000e+00 : f32
    %294 = vector.broadcast %cst_67 : f32 to vector<4x1xf32>
    %295 = arith.subf %294, %272 : vector<4x1xf32>
    %296 = vector.broadcast %295 : vector<4x1xf32> to vector<4x32xf32>
    %297 = arith.mulf %296, %203 : vector<4x32xf32>
    %298 = arith.addf %293, %297 : vector<4x32xf32>
    %299 = tpu.concatenate %291, %298 in 1 : vector<4x32xf32>, vector<4x32xf32> -> vector<4x64xf32>
    %c3_i32 = arith.constant 3 : i32
    %c7_i32_68 = arith.constant 7 : i32
    %300 = arith.subi %c7_i32_68, %c3_i32 : i32
    %301 = vector.extract_strided_slice %299 {offsets = [0, 0], sizes = [4, 32], strides = [1, 1]} : vector<4x64xf32> to vector<4x32xf32>
    %302 = vector.extract_strided_slice %299 {offsets = [0, 32], sizes = [4, 32], strides = [1, 1]} : vector<4x64xf32> to vector<4x32xf32>
    %cst_69 = arith.constant dense<0.000000e+00> : vector<4x192xf32>
    %303 = tpu.matmul %299, %0, %cst_69 {dimension_numbers = #tpu.dot_dimension_numbers<[1], [0], [0], [1], [0, 0, 1, 1], [], []>} : vector<4x64xf32>, vector<64x192xf32>, vector<4x192xf32> -> vector<4x192xf32>
    %304 = vector.broadcast %1 : vector<1x192xf32> to vector<4x192xf32>
    %305 = arith.addf %303, %304 : vector<4x192xf32>
    %306 = arith.index_cast %c3_i32 : i32 to index
    %c0_70 = arith.constant 0 : index
    %c0_71 = arith.constant 0 : index
    %307 = vector.load %arg0[%306, %c0_70, %c0_71] : memref<8x4x96xf32, #tpu.memory_space<vmem>>, vector<1x4x96xf32>
    %308 = vector.shape_cast %307 : vector<1x4x96xf32> to vector<4x96xf32>
    %309 = vector.extract_strided_slice %305 {offsets = [0, 0], sizes = [4, 96], strides = [1, 1]} : vector<4x192xf32> to vector<4x96xf32>
    %310 = vector.extract_strided_slice %308 {offsets = [0, 0], sizes = [4, 32], strides = [1, 1]} : vector<4x96xf32> to vector<4x32xf32>
    %311 = vector.extract_strided_slice %309 {offsets = [0, 0], sizes = [4, 32], strides = [1, 1]} : vector<4x96xf32> to vector<4x32xf32>
    %312 = arith.addf %310, %311 : vector<4x32xf32>
    %313 = arith.negf %312 : vector<4x32xf32>
    %314 = math.exp %313 : vector<4x32xf32>
    %cst_72 = arith.constant 1.000000e+00 : f32
    %315 = vector.broadcast %cst_72 : f32 to vector<4x32xf32>
    %316 = arith.addf %315, %314 : vector<4x32xf32>
    %317 = arith.divf %315, %316 : vector<4x32xf32>
    %318 = vector.extract_strided_slice %308 {offsets = [0, 32], sizes = [4, 32], strides = [1, 1]} : vector<4x96xf32> to vector<4x32xf32>
    %319 = vector.extract_strided_slice %309 {offsets = [0, 32], sizes = [4, 32], strides = [1, 1]} : vector<4x96xf32> to vector<4x32xf32>
    %320 = arith.addf %318, %319 : vector<4x32xf32>
    %321 = arith.negf %320 : vector<4x32xf32>
    %322 = math.exp %321 : vector<4x32xf32>
    %cst_73 = arith.constant 1.000000e+00 : f32
    %323 = vector.broadcast %cst_73 : f32 to vector<4x32xf32>
    %324 = arith.addf %323, %322 : vector<4x32xf32>
    %325 = arith.divf %323, %324 : vector<4x32xf32>
    %326 = vector.extract_strided_slice %308 {offsets = [0, 64], sizes = [4, 32], strides = [1, 1]} : vector<4x96xf32> to vector<4x32xf32>
    %327 = vector.extract_strided_slice %309 {offsets = [0, 64], sizes = [4, 32], strides = [1, 1]} : vector<4x96xf32> to vector<4x32xf32>
    %328 = arith.mulf %317, %327 : vector<4x32xf32>
    %329 = arith.addf %326, %328 : vector<4x32xf32>
    %330 = math.tanh %329 : vector<4x32xf32>
    %cst_74 = arith.constant 1.000000e+00 : f32
    %331 = vector.broadcast %cst_74 : f32 to vector<4x32xf32>
    %332 = arith.subf %331, %325 : vector<4x32xf32>
    %333 = arith.mulf %332, %330 : vector<4x32xf32>
    %334 = arith.mulf %325, %301 : vector<4x32xf32>
    %335 = arith.addf %333, %334 : vector<4x32xf32>
    %336 = arith.index_cast %300 : i32 to index
    %c0_75 = arith.constant 0 : index
    %c0_76 = arith.constant 0 : index
    %337 = vector.load %arg1[%336, %c0_75, %c0_76] : memref<8x4x96xf32, #tpu.memory_space<vmem>>, vector<1x4x96xf32>
    %338 = vector.shape_cast %337 : vector<1x4x96xf32> to vector<4x96xf32>
    %339 = vector.extract_strided_slice %305 {offsets = [0, 96], sizes = [4, 96], strides = [1, 1]} : vector<4x192xf32> to vector<4x96xf32>
    %340 = vector.extract_strided_slice %338 {offsets = [0, 0], sizes = [4, 32], strides = [1, 1]} : vector<4x96xf32> to vector<4x32xf32>
    %341 = vector.extract_strided_slice %339 {offsets = [0, 0], sizes = [4, 32], strides = [1, 1]} : vector<4x96xf32> to vector<4x32xf32>
    %342 = arith.addf %340, %341 : vector<4x32xf32>
    %343 = arith.negf %342 : vector<4x32xf32>
    %344 = math.exp %343 : vector<4x32xf32>
    %cst_77 = arith.constant 1.000000e+00 : f32
    %345 = vector.broadcast %cst_77 : f32 to vector<4x32xf32>
    %346 = arith.addf %345, %344 : vector<4x32xf32>
    %347 = arith.divf %345, %346 : vector<4x32xf32>
    %348 = vector.extract_strided_slice %338 {offsets = [0, 32], sizes = [4, 32], strides = [1, 1]} : vector<4x96xf32> to vector<4x32xf32>
    %349 = vector.extract_strided_slice %339 {offsets = [0, 32], sizes = [4, 32], strides = [1, 1]} : vector<4x96xf32> to vector<4x32xf32>
    %350 = arith.addf %348, %349 : vector<4x32xf32>
    %351 = arith.negf %350 : vector<4x32xf32>
    %352 = math.exp %351 : vector<4x32xf32>
    %cst_78 = arith.constant 1.000000e+00 : f32
    %353 = vector.broadcast %cst_78 : f32 to vector<4x32xf32>
    %354 = arith.addf %353, %352 : vector<4x32xf32>
    %355 = arith.divf %353, %354 : vector<4x32xf32>
    %356 = vector.extract_strided_slice %338 {offsets = [0, 64], sizes = [4, 32], strides = [1, 1]} : vector<4x96xf32> to vector<4x32xf32>
    %357 = vector.extract_strided_slice %339 {offsets = [0, 64], sizes = [4, 32], strides = [1, 1]} : vector<4x96xf32> to vector<4x32xf32>
    %358 = arith.mulf %347, %357 : vector<4x32xf32>
    %359 = arith.addf %356, %358 : vector<4x32xf32>
    %360 = math.tanh %359 : vector<4x32xf32>
    %cst_79 = arith.constant 1.000000e+00 : f32
    %361 = vector.broadcast %cst_79 : f32 to vector<4x32xf32>
    %362 = arith.subf %361, %355 : vector<4x32xf32>
    %363 = arith.mulf %362, %360 : vector<4x32xf32>
    %364 = arith.mulf %355, %302 : vector<4x32xf32>
    %365 = arith.addf %363, %364 : vector<4x32xf32>
    %366 = arith.index_cast %c3_i32 : i32 to index
    %c0_80 = arith.constant 0 : index
    %c0_81 = arith.constant 0 : index
    %367 = vector.load %arg2[%366, %c0_80, %c0_81] : memref<8x4x1xf32, #tpu.memory_space<vmem>>, vector<1x4x1xf32>
    %368 = vector.shape_cast %367 : vector<1x4x1xf32> to vector<4x1xf32>
    %369 = arith.index_cast %300 : i32 to index
    %c0_82 = arith.constant 0 : index
    %c0_83 = arith.constant 0 : index
    %370 = vector.load %arg2[%369, %c0_82, %c0_83] : memref<8x4x1xf32, #tpu.memory_space<vmem>>, vector<1x4x1xf32>
    %371 = vector.shape_cast %370 : vector<1x4x1xf32> to vector<4x1xf32>
    %372 = vector.broadcast %368 : vector<4x1xf32> to vector<4x32xf32>
    %373 = arith.mulf %372, %335 : vector<4x32xf32>
    %374 = arith.index_cast %c3_i32 : i32 to index
    %c0_84 = arith.constant 0 : index
    %c0_85 = arith.constant 0 : index
    %375 = vector.load %arg6[%374, %c0_84, %c0_85] : memref<8x4x64xf32, #tpu.memory_space<vmem>>, vector<1x4x32xf32>
    %376 = vector.shape_cast %375 : vector<1x4x32xf32> to vector<4x32xf32>
    %377 = vector.shape_cast %373 : vector<4x32xf32> to vector<1x4x32xf32>
    tpu.vector_store %arg6[%374, %c0_84, %c0_85], %377 {strides = array<i32>} : memref<8x4x64xf32, #tpu.memory_space<vmem>>, vector<1x4x32xf32>,
    %378 = vector.broadcast %371 : vector<4x1xf32> to vector<4x32xf32>
    %379 = arith.mulf %378, %365 : vector<4x32xf32>
    %380 = arith.index_cast %300 : i32 to index
    %c0_86 = arith.constant 0 : index
    %c32_87 = arith.constant 32 : index
    %381 = vector.load %arg6[%380, %c0_86, %c32_87] : memref<8x4x64xf32, #tpu.memory_space<vmem>>, vector<1x4x32xf32>
    %382 = vector.shape_cast %381 : vector<1x4x32xf32> to vector<4x32xf32>
    %383 = vector.shape_cast %379 : vector<4x32xf32> to vector<1x4x32xf32>
    tpu.vector_store %arg6[%380, %c0_86, %c32_87], %383 {strides = array<i32>} : memref<8x4x64xf32, #tpu.memory_space<vmem>>, vector<1x4x32xf32>,
    %384 = vector.broadcast %368 : vector<4x1xf32> to vector<4x32xf32>
    %385 = arith.mulf %384, %335 : vector<4x32xf32>
    %cst_88 = arith.constant 1.000000e+00 : f32
    %386 = vector.broadcast %cst_88 : f32 to vector<4x1xf32>
    %387 = arith.subf %386, %368 : vector<4x1xf32>
    %388 = vector.broadcast %387 : vector<4x1xf32> to vector<4x32xf32>
    %389 = arith.mulf %388, %301 : vector<4x32xf32>
    %390 = arith.addf %385, %389 : vector<4x32xf32>
    %391 = vector.broadcast %371 : vector<4x1xf32> to vector<4x32xf32>
    %392 = arith.mulf %391, %365 : vector<4x32xf32>
    %cst_89 = arith.constant 1.000000e+00 : f32
    %393 = vector.broadcast %cst_89 : f32 to vector<4x1xf32>
    %394 = arith.subf %393, %371 : vector<4x1xf32>
    %395 = vector.broadcast %394 : vector<4x1xf32> to vector<4x32xf32>
    %396 = arith.mulf %395, %302 : vector<4x32xf32>
    %397 = arith.addf %392, %396 : vector<4x32xf32>
    %398 = tpu.concatenate %390, %397 in 1 : vector<4x32xf32>, vector<4x32xf32> -> vector<4x64xf32>
    %c4_i32 = arith.constant 4 : i32
    %c7_i32_90 = arith.constant 7 : i32
    %399 = arith.subi %c7_i32_90, %c4_i32 : i32
    %400 = vector.extract_strided_slice %398 {offsets = [0, 0], sizes = [4, 32], strides = [1, 1]} : vector<4x64xf32> to vector<4x32xf32>
    %401 = vector.extract_strided_slice %398 {offsets = [0, 32], sizes = [4, 32], strides = [1, 1]} : vector<4x64xf32> to vector<4x32xf32>
    %cst_91 = arith.constant dense<0.000000e+00> : vector<4x192xf32>
    %402 = tpu.matmul %398, %0, %cst_91 {dimension_numbers = #tpu.dot_dimension_numbers<[1], [0], [0], [1], [0, 0, 1, 1], [], []>} : vector<4x64xf32>, vector<64x192xf32>, vector<4x192xf32> -> vector<4x192xf32>
    %403 = vector.broadcast %1 : vector<1x192xf32> to vector<4x192xf32>
    %404 = arith.addf %402, %403 : vector<4x192xf32>
    %405 = arith.index_cast %c4_i32 : i32 to index
    %c0_92 = arith.constant 0 : index
    %c0_93 = arith.constant 0 : index
    %406 = vector.load %arg0[%405, %c0_92, %c0_93] : memref<8x4x96xf32, #tpu.memory_space<vmem>>, vector<1x4x96xf32>
    %407 = vector.shape_cast %406 : vector<1x4x96xf32> to vector<4x96xf32>
    %408 = vector.extract_strided_slice %404 {offsets = [0, 0], sizes = [4, 96], strides = [1, 1]} : vector<4x192xf32> to vector<4x96xf32>
    %409 = vector.extract_strided_slice %407 {offsets = [0, 0], sizes = [4, 32], strides = [1, 1]} : vector<4x96xf32> to vector<4x32xf32>
    %410 = vector.extract_strided_slice %408 {offsets = [0, 0], sizes = [4, 32], strides = [1, 1]} : vector<4x96xf32> to vector<4x32xf32>
    %411 = arith.addf %409, %410 : vector<4x32xf32>
    %412 = arith.negf %411 : vector<4x32xf32>
    %413 = math.exp %412 : vector<4x32xf32>
    %cst_94 = arith.constant 1.000000e+00 : f32
    %414 = vector.broadcast %cst_94 : f32 to vector<4x32xf32>
    %415 = arith.addf %414, %413 : vector<4x32xf32>
    %416 = arith.divf %414, %415 : vector<4x32xf32>
    %417 = vector.extract_strided_slice %407 {offsets = [0, 32], sizes = [4, 32], strides = [1, 1]} : vector<4x96xf32> to vector<4x32xf32>
    %418 = vector.extract_strided_slice %408 {offsets = [0, 32], sizes = [4, 32], strides = [1, 1]} : vector<4x96xf32> to vector<4x32xf32>
    %419 = arith.addf %417, %418 : vector<4x32xf32>
    %420 = arith.negf %419 : vector<4x32xf32>
    %421 = math.exp %420 : vector<4x32xf32>
    %cst_95 = arith.constant 1.000000e+00 : f32
    %422 = vector.broadcast %cst_95 : f32 to vector<4x32xf32>
    %423 = arith.addf %422, %421 : vector<4x32xf32>
    %424 = arith.divf %422, %423 : vector<4x32xf32>
    %425 = vector.extract_strided_slice %407 {offsets = [0, 64], sizes = [4, 32], strides = [1, 1]} : vector<4x96xf32> to vector<4x32xf32>
    %426 = vector.extract_strided_slice %408 {offsets = [0, 64], sizes = [4, 32], strides = [1, 1]} : vector<4x96xf32> to vector<4x32xf32>
    %427 = arith.mulf %416, %426 : vector<4x32xf32>
    %428 = arith.addf %425, %427 : vector<4x32xf32>
    %429 = math.tanh %428 : vector<4x32xf32>
    %cst_96 = arith.constant 1.000000e+00 : f32
    %430 = vector.broadcast %cst_96 : f32 to vector<4x32xf32>
    %431 = arith.subf %430, %424 : vector<4x32xf32>
    %432 = arith.mulf %431, %429 : vector<4x32xf32>
    %433 = arith.mulf %424, %400 : vector<4x32xf32>
    %434 = arith.addf %432, %433 : vector<4x32xf32>
    %435 = arith.index_cast %399 : i32 to index
    %c0_97 = arith.constant 0 : index
    %c0_98 = arith.constant 0 : index
    %436 = vector.load %arg1[%435, %c0_97, %c0_98] : memref<8x4x96xf32, #tpu.memory_space<vmem>>, vector<1x4x96xf32>
    %437 = vector.shape_cast %436 : vector<1x4x96xf32> to vector<4x96xf32>
    %438 = vector.extract_strided_slice %404 {offsets = [0, 96], sizes = [4, 96], strides = [1, 1]} : vector<4x192xf32> to vector<4x96xf32>
    %439 = vector.extract_strided_slice %437 {offsets = [0, 0], sizes = [4, 32], strides = [1, 1]} : vector<4x96xf32> to vector<4x32xf32>
    %440 = vector.extract_strided_slice %438 {offsets = [0, 0], sizes = [4, 32], strides = [1, 1]} : vector<4x96xf32> to vector<4x32xf32>
    %441 = arith.addf %439, %440 : vector<4x32xf32>
    %442 = arith.negf %441 : vector<4x32xf32>
    %443 = math.exp %442 : vector<4x32xf32>
    %cst_99 = arith.constant 1.000000e+00 : f32
    %444 = vector.broadcast %cst_99 : f32 to vector<4x32xf32>
    %445 = arith.addf %444, %443 : vector<4x32xf32>
    %446 = arith.divf %444, %445 : vector<4x32xf32>
    %447 = vector.extract_strided_slice %437 {offsets = [0, 32], sizes = [4, 32], strides = [1, 1]} : vector<4x96xf32> to vector<4x32xf32>
    %448 = vector.extract_strided_slice %438 {offsets = [0, 32], sizes = [4, 32], strides = [1, 1]} : vector<4x96xf32> to vector<4x32xf32>
    %449 = arith.addf %447, %448 : vector<4x32xf32>
    %450 = arith.negf %449 : vector<4x32xf32>
    %451 = math.exp %450 : vector<4x32xf32>
    %cst_100 = arith.constant 1.000000e+00 : f32
    %452 = vector.broadcast %cst_100 : f32 to vector<4x32xf32>
    %453 = arith.addf %452, %451 : vector<4x32xf32>
    %454 = arith.divf %452, %453 : vector<4x32xf32>
    %455 = vector.extract_strided_slice %437 {offsets = [0, 64], sizes = [4, 32], strides = [1, 1]} : vector<4x96xf32> to vector<4x32xf32>
    %456 = vector.extract_strided_slice %438 {offsets = [0, 64], sizes = [4, 32], strides = [1, 1]} : vector<4x96xf32> to vector<4x32xf32>
    %457 = arith.mulf %446, %456 : vector<4x32xf32>
    %458 = arith.addf %455, %457 : vector<4x32xf32>
    %459 = math.tanh %458 : vector<4x32xf32>
    %cst_101 = arith.constant 1.000000e+00 : f32
    %460 = vector.broadcast %cst_101 : f32 to vector<4x32xf32>
    %461 = arith.subf %460, %454 : vector<4x32xf32>
    %462 = arith.mulf %461, %459 : vector<4x32xf32>
    %463 = arith.mulf %454, %401 : vector<4x32xf32>
    %464 = arith.addf %462, %463 : vector<4x32xf32>
    %465 = arith.index_cast %c4_i32 : i32 to index
    %c0_102 = arith.constant 0 : index
    %c0_103 = arith.constant 0 : index
    %466 = vector.load %arg2[%465, %c0_102, %c0_103] : memref<8x4x1xf32, #tpu.memory_space<vmem>>, vector<1x4x1xf32>
    %467 = vector.shape_cast %466 : vector<1x4x1xf32> to vector<4x1xf32>
    %468 = arith.index_cast %399 : i32 to index
    %c0_104 = arith.constant 0 : index
    %c0_105 = arith.constant 0 : index
    %469 = vector.load %arg2[%468, %c0_104, %c0_105] : memref<8x4x1xf32, #tpu.memory_space<vmem>>, vector<1x4x1xf32>
    %470 = vector.shape_cast %469 : vector<1x4x1xf32> to vector<4x1xf32>
    %471 = vector.broadcast %467 : vector<4x1xf32> to vector<4x32xf32>
    %472 = arith.mulf %471, %434 : vector<4x32xf32>
    %473 = arith.index_cast %c4_i32 : i32 to index
    %c0_106 = arith.constant 0 : index
    %c0_107 = arith.constant 0 : index
    %474 = vector.load %arg6[%473, %c0_106, %c0_107] : memref<8x4x64xf32, #tpu.memory_space<vmem>>, vector<1x4x32xf32>
    %475 = vector.shape_cast %474 : vector<1x4x32xf32> to vector<4x32xf32>
    %476 = vector.shape_cast %472 : vector<4x32xf32> to vector<1x4x32xf32>
    tpu.vector_store %arg6[%473, %c0_106, %c0_107], %476 {strides = array<i32>} : memref<8x4x64xf32, #tpu.memory_space<vmem>>, vector<1x4x32xf32>,
    %477 = vector.broadcast %470 : vector<4x1xf32> to vector<4x32xf32>
    %478 = arith.mulf %477, %464 : vector<4x32xf32>
    %479 = arith.index_cast %399 : i32 to index
    %c0_108 = arith.constant 0 : index
    %c32_109 = arith.constant 32 : index
    %480 = vector.load %arg6[%479, %c0_108, %c32_109] : memref<8x4x64xf32, #tpu.memory_space<vmem>>, vector<1x4x32xf32>
    %481 = vector.shape_cast %480 : vector<1x4x32xf32> to vector<4x32xf32>
    %482 = vector.shape_cast %478 : vector<4x32xf32> to vector<1x4x32xf32>
    tpu.vector_store %arg6[%479, %c0_108, %c32_109], %482 {strides = array<i32>} : memref<8x4x64xf32, #tpu.memory_space<vmem>>, vector<1x4x32xf32>,
    %483 = vector.broadcast %467 : vector<4x1xf32> to vector<4x32xf32>
    %484 = arith.mulf %483, %434 : vector<4x32xf32>
    %cst_110 = arith.constant 1.000000e+00 : f32
    %485 = vector.broadcast %cst_110 : f32 to vector<4x1xf32>
    %486 = arith.subf %485, %467 : vector<4x1xf32>
    %487 = vector.broadcast %486 : vector<4x1xf32> to vector<4x32xf32>
    %488 = arith.mulf %487, %400 : vector<4x32xf32>
    %489 = arith.addf %484, %488 : vector<4x32xf32>
    %490 = vector.broadcast %470 : vector<4x1xf32> to vector<4x32xf32>
    %491 = arith.mulf %490, %464 : vector<4x32xf32>
    %cst_111 = arith.constant 1.000000e+00 : f32
    %492 = vector.broadcast %cst_111 : f32 to vector<4x1xf32>
    %493 = arith.subf %492, %470 : vector<4x1xf32>
    %494 = vector.broadcast %493 : vector<4x1xf32> to vector<4x32xf32>
    %495 = arith.mulf %494, %401 : vector<4x32xf32>
    %496 = arith.addf %491, %495 : vector<4x32xf32>
    %497 = tpu.concatenate %489, %496 in 1 : vector<4x32xf32>, vector<4x32xf32> -> vector<4x64xf32>
    %c5_i32 = arith.constant 5 : i32
    %c7_i32_112 = arith.constant 7 : i32
    %498 = arith.subi %c7_i32_112, %c5_i32 : i32
    %499 = vector.extract_strided_slice %497 {offsets = [0, 0], sizes = [4, 32], strides = [1, 1]} : vector<4x64xf32> to vector<4x32xf32>
    %500 = vector.extract_strided_slice %497 {offsets = [0, 32], sizes = [4, 32], strides = [1, 1]} : vector<4x64xf32> to vector<4x32xf32>
    %cst_113 = arith.constant dense<0.000000e+00> : vector<4x192xf32>
    %501 = tpu.matmul %497, %0, %cst_113 {dimension_numbers = #tpu.dot_dimension_numbers<[1], [0], [0], [1], [0, 0, 1, 1], [], []>} : vector<4x64xf32>, vector<64x192xf32>, vector<4x192xf32> -> vector<4x192xf32>
    %502 = vector.broadcast %1 : vector<1x192xf32> to vector<4x192xf32>
    %503 = arith.addf %501, %502 : vector<4x192xf32>
    %504 = arith.index_cast %c5_i32 : i32 to index
    %c0_114 = arith.constant 0 : index
    %c0_115 = arith.constant 0 : index
    %505 = vector.load %arg0[%504, %c0_114, %c0_115] : memref<8x4x96xf32, #tpu.memory_space<vmem>>, vector<1x4x96xf32>
    %506 = vector.shape_cast %505 : vector<1x4x96xf32> to vector<4x96xf32>
    %507 = vector.extract_strided_slice %503 {offsets = [0, 0], sizes = [4, 96], strides = [1, 1]} : vector<4x192xf32> to vector<4x96xf32>
    %508 = vector.extract_strided_slice %506 {offsets = [0, 0], sizes = [4, 32], strides = [1, 1]} : vector<4x96xf32> to vector<4x32xf32>
    %509 = vector.extract_strided_slice %507 {offsets = [0, 0], sizes = [4, 32], strides = [1, 1]} : vector<4x96xf32> to vector<4x32xf32>
    %510 = arith.addf %508, %509 : vector<4x32xf32>
    %511 = arith.negf %510 : vector<4x32xf32>
    %512 = math.exp %511 : vector<4x32xf32>
    %cst_116 = arith.constant 1.000000e+00 : f32
    %513 = vector.broadcast %cst_116 : f32 to vector<4x32xf32>
    %514 = arith.addf %513, %512 : vector<4x32xf32>
    %515 = arith.divf %513, %514 : vector<4x32xf32>
    %516 = vector.extract_strided_slice %506 {offsets = [0, 32], sizes = [4, 32], strides = [1, 1]} : vector<4x96xf32> to vector<4x32xf32>
    %517 = vector.extract_strided_slice %507 {offsets = [0, 32], sizes = [4, 32], strides = [1, 1]} : vector<4x96xf32> to vector<4x32xf32>
    %518 = arith.addf %516, %517 : vector<4x32xf32>
    %519 = arith.negf %518 : vector<4x32xf32>
    %520 = math.exp %519 : vector<4x32xf32>
    %cst_117 = arith.constant 1.000000e+00 : f32
    %521 = vector.broadcast %cst_117 : f32 to vector<4x32xf32>
    %522 = arith.addf %521, %520 : vector<4x32xf32>
    %523 = arith.divf %521, %522 : vector<4x32xf32>
    %524 = vector.extract_strided_slice %506 {offsets = [0, 64], sizes = [4, 32], strides = [1, 1]} : vector<4x96xf32> to vector<4x32xf32>
    %525 = vector.extract_strided_slice %507 {offsets = [0, 64], sizes = [4, 32], strides = [1, 1]} : vector<4x96xf32> to vector<4x32xf32>
    %526 = arith.mulf %515, %525 : vector<4x32xf32>
    %527 = arith.addf %524, %526 : vector<4x32xf32>
    %528 = math.tanh %527 : vector<4x32xf32>
    %cst_118 = arith.constant 1.000000e+00 : f32
    %529 = vector.broadcast %cst_118 : f32 to vector<4x32xf32>
    %530 = arith.subf %529, %523 : vector<4x32xf32>
    %531 = arith.mulf %530, %528 : vector<4x32xf32>
    %532 = arith.mulf %523, %499 : vector<4x32xf32>
    %533 = arith.addf %531, %532 : vector<4x32xf32>
    %534 = arith.index_cast %498 : i32 to index
    %c0_119 = arith.constant 0 : index
    %c0_120 = arith.constant 0 : index
    %535 = vector.load %arg1[%534, %c0_119, %c0_120] : memref<8x4x96xf32, #tpu.memory_space<vmem>>, vector<1x4x96xf32>
    %536 = vector.shape_cast %535 : vector<1x4x96xf32> to vector<4x96xf32>
    %537 = vector.extract_strided_slice %503 {offsets = [0, 96], sizes = [4, 96], strides = [1, 1]} : vector<4x192xf32> to vector<4x96xf32>
    %538 = vector.extract_strided_slice %536 {offsets = [0, 0], sizes = [4, 32], strides = [1, 1]} : vector<4x96xf32> to vector<4x32xf32>
    %539 = vector.extract_strided_slice %537 {offsets = [0, 0], sizes = [4, 32], strides = [1, 1]} : vector<4x96xf32> to vector<4x32xf32>
    %540 = arith.addf %538, %539 : vector<4x32xf32>
    %541 = arith.negf %540 : vector<4x32xf32>
    %542 = math.exp %541 : vector<4x32xf32>
    %cst_121 = arith.constant 1.000000e+00 : f32
    %543 = vector.broadcast %cst_121 : f32 to vector<4x32xf32>
    %544 = arith.addf %543, %542 : vector<4x32xf32>
    %545 = arith.divf %543, %544 : vector<4x32xf32>
    %546 = vector.extract_strided_slice %536 {offsets = [0, 32], sizes = [4, 32], strides = [1, 1]} : vector<4x96xf32> to vector<4x32xf32>
    %547 = vector.extract_strided_slice %537 {offsets = [0, 32], sizes = [4, 32], strides = [1, 1]} : vector<4x96xf32> to vector<4x32xf32>
    %548 = arith.addf %546, %547 : vector<4x32xf32>
    %549 = arith.negf %548 : vector<4x32xf32>
    %550 = math.exp %549 : vector<4x32xf32>
    %cst_122 = arith.constant 1.000000e+00 : f32
    %551 = vector.broadcast %cst_122 : f32 to vector<4x32xf32>
    %552 = arith.addf %551, %550 : vector<4x32xf32>
    %553 = arith.divf %551, %552 : vector<4x32xf32>
    %554 = vector.extract_strided_slice %536 {offsets = [0, 64], sizes = [4, 32], strides = [1, 1]} : vector<4x96xf32> to vector<4x32xf32>
    %555 = vector.extract_strided_slice %537 {offsets = [0, 64], sizes = [4, 32], strides = [1, 1]} : vector<4x96xf32> to vector<4x32xf32>
    %556 = arith.mulf %545, %555 : vector<4x32xf32>
    %557 = arith.addf %554, %556 : vector<4x32xf32>
    %558 = math.tanh %557 : vector<4x32xf32>
    %cst_123 = arith.constant 1.000000e+00 : f32
    %559 = vector.broadcast %cst_123 : f32 to vector<4x32xf32>
    %560 = arith.subf %559, %553 : vector<4x32xf32>
    %561 = arith.mulf %560, %558 : vector<4x32xf32>
    %562 = arith.mulf %553, %500 : vector<4x32xf32>
    %563 = arith.addf %561, %562 : vector<4x32xf32>
    %564 = arith.index_cast %c5_i32 : i32 to index
    %c0_124 = arith.constant 0 : index
    %c0_125 = arith.constant 0 : index
    %565 = vector.load %arg2[%564, %c0_124, %c0_125] : memref<8x4x1xf32, #tpu.memory_space<vmem>>, vector<1x4x1xf32>
    %566 = vector.shape_cast %565 : vector<1x4x1xf32> to vector<4x1xf32>
    %567 = arith.index_cast %498 : i32 to index
    %c0_126 = arith.constant 0 : index
    %c0_127 = arith.constant 0 : index
    %568 = vector.load %arg2[%567, %c0_126, %c0_127] : memref<8x4x1xf32, #tpu.memory_space<vmem>>, vector<1x4x1xf32>
    %569 = vector.shape_cast %568 : vector<1x4x1xf32> to vector<4x1xf32>
    %570 = vector.broadcast %566 : vector<4x1xf32> to vector<4x32xf32>
    %571 = arith.mulf %570, %533 : vector<4x32xf32>
    %572 = arith.index_cast %c5_i32 : i32 to index
    %c0_128 = arith.constant 0 : index
    %c0_129 = arith.constant 0 : index
    %573 = vector.load %arg6[%572, %c0_128, %c0_129] : memref<8x4x64xf32, #tpu.memory_space<vmem>>, vector<1x4x32xf32>
    %574 = vector.shape_cast %573 : vector<1x4x32xf32> to vector<4x32xf32>
    %575 = vector.shape_cast %571 : vector<4x32xf32> to vector<1x4x32xf32>
    tpu.vector_store %arg6[%572, %c0_128, %c0_129], %575 {strides = array<i32>} : memref<8x4x64xf32, #tpu.memory_space<vmem>>, vector<1x4x32xf32>,
    %576 = vector.broadcast %569 : vector<4x1xf32> to vector<4x32xf32>
    %577 = arith.mulf %576, %563 : vector<4x32xf32>
    %578 = arith.index_cast %498 : i32 to index
    %c0_130 = arith.constant 0 : index
    %c32_131 = arith.constant 32 : index
    %579 = vector.load %arg6[%578, %c0_130, %c32_131] : memref<8x4x64xf32, #tpu.memory_space<vmem>>, vector<1x4x32xf32>
    %580 = vector.shape_cast %579 : vector<1x4x32xf32> to vector<4x32xf32>
    %581 = vector.shape_cast %577 : vector<4x32xf32> to vector<1x4x32xf32>
    tpu.vector_store %arg6[%578, %c0_130, %c32_131], %581 {strides = array<i32>} : memref<8x4x64xf32, #tpu.memory_space<vmem>>, vector<1x4x32xf32>,
    %582 = vector.broadcast %566 : vector<4x1xf32> to vector<4x32xf32>
    %583 = arith.mulf %582, %533 : vector<4x32xf32>
    %cst_132 = arith.constant 1.000000e+00 : f32
    %584 = vector.broadcast %cst_132 : f32 to vector<4x1xf32>
    %585 = arith.subf %584, %566 : vector<4x1xf32>
    %586 = vector.broadcast %585 : vector<4x1xf32> to vector<4x32xf32>
    %587 = arith.mulf %586, %499 : vector<4x32xf32>
    %588 = arith.addf %583, %587 : vector<4x32xf32>
    %589 = vector.broadcast %569 : vector<4x1xf32> to vector<4x32xf32>
    %590 = arith.mulf %589, %563 : vector<4x32xf32>
    %cst_133 = arith.constant 1.000000e+00 : f32
    %591 = vector.broadcast %cst_133 : f32 to vector<4x1xf32>
    %592 = arith.subf %591, %569 : vector<4x1xf32>
    %593 = vector.broadcast %592 : vector<4x1xf32> to vector<4x32xf32>
    %594 = arith.mulf %593, %500 : vector<4x32xf32>
    %595 = arith.addf %590, %594 : vector<4x32xf32>
    %596 = tpu.concatenate %588, %595 in 1 : vector<4x32xf32>, vector<4x32xf32> -> vector<4x64xf32>
    %c6_i32 = arith.constant 6 : i32
    %c7_i32_134 = arith.constant 7 : i32
    %597 = arith.subi %c7_i32_134, %c6_i32 : i32
    %598 = vector.extract_strided_slice %596 {offsets = [0, 0], sizes = [4, 32], strides = [1, 1]} : vector<4x64xf32> to vector<4x32xf32>
    %599 = vector.extract_strided_slice %596 {offsets = [0, 32], sizes = [4, 32], strides = [1, 1]} : vector<4x64xf32> to vector<4x32xf32>
    %cst_135 = arith.constant dense<0.000000e+00> : vector<4x192xf32>
    %600 = tpu.matmul %596, %0, %cst_135 {dimension_numbers = #tpu.dot_dimension_numbers<[1], [0], [0], [1], [0, 0, 1, 1], [], []>} : vector<4x64xf32>, vector<64x192xf32>, vector<4x192xf32> -> vector<4x192xf32>
    %601 = vector.broadcast %1 : vector<1x192xf32> to vector<4x192xf32>
    %602 = arith.addf %600, %601 : vector<4x192xf32>
    %603 = arith.index_cast %c6_i32 : i32 to index
    %c0_136 = arith.constant 0 : index
    %c0_137 = arith.constant 0 : index
    %604 = vector.load %arg0[%603, %c0_136, %c0_137] : memref<8x4x96xf32, #tpu.memory_space<vmem>>, vector<1x4x96xf32>
    %605 = vector.shape_cast %604 : vector<1x4x96xf32> to vector<4x96xf32>
    %606 = vector.extract_strided_slice %602 {offsets = [0, 0], sizes = [4, 96], strides = [1, 1]} : vector<4x192xf32> to vector<4x96xf32>
    %607 = vector.extract_strided_slice %605 {offsets = [0, 0], sizes = [4, 32], strides = [1, 1]} : vector<4x96xf32> to vector<4x32xf32>
    %608 = vector.extract_strided_slice %606 {offsets = [0, 0], sizes = [4, 32], strides = [1, 1]} : vector<4x96xf32> to vector<4x32xf32>
    %609 = arith.addf %607, %608 : vector<4x32xf32>
    %610 = arith.negf %609 : vector<4x32xf32>
    %611 = math.exp %610 : vector<4x32xf32>
    %cst_138 = arith.constant 1.000000e+00 : f32
    %612 = vector.broadcast %cst_138 : f32 to vector<4x32xf32>
    %613 = arith.addf %612, %611 : vector<4x32xf32>
    %614 = arith.divf %612, %613 : vector<4x32xf32>
    %615 = vector.extract_strided_slice %605 {offsets = [0, 32], sizes = [4, 32], strides = [1, 1]} : vector<4x96xf32> to vector<4x32xf32>
    %616 = vector.extract_strided_slice %606 {offsets = [0, 32], sizes = [4, 32], strides = [1, 1]} : vector<4x96xf32> to vector<4x32xf32>
    %617 = arith.addf %615, %616 : vector<4x32xf32>
    %618 = arith.negf %617 : vector<4x32xf32>
    %619 = math.exp %618 : vector<4x32xf32>
    %cst_139 = arith.constant 1.000000e+00 : f32
    %620 = vector.broadcast %cst_139 : f32 to vector<4x32xf32>
    %621 = arith.addf %620, %619 : vector<4x32xf32>
    %622 = arith.divf %620, %621 : vector<4x32xf32>
    %623 = vector.extract_strided_slice %605 {offsets = [0, 64], sizes = [4, 32], strides = [1, 1]} : vector<4x96xf32> to vector<4x32xf32>
    %624 = vector.extract_strided_slice %606 {offsets = [0, 64], sizes = [4, 32], strides = [1, 1]} : vector<4x96xf32> to vector<4x32xf32>
    %625 = arith.mulf %614, %624 : vector<4x32xf32>
    %626 = arith.addf %623, %625 : vector<4x32xf32>
    %627 = math.tanh %626 : vector<4x32xf32>
    %cst_140 = arith.constant 1.000000e+00 : f32
    %628 = vector.broadcast %cst_140 : f32 to vector<4x32xf32>
    %629 = arith.subf %628, %622 : vector<4x32xf32>
    %630 = arith.mulf %629, %627 : vector<4x32xf32>
    %631 = arith.mulf %622, %598 : vector<4x32xf32>
    %632 = arith.addf %630, %631 : vector<4x32xf32>
    %633 = arith.index_cast %597 : i32 to index
    %c0_141 = arith.constant 0 : index
    %c0_142 = arith.constant 0 : index
    %634 = vector.load %arg1[%633, %c0_141, %c0_142] : memref<8x4x96xf32, #tpu.memory_space<vmem>>, vector<1x4x96xf32>
    %635 = vector.shape_cast %634 : vector<1x4x96xf32> to vector<4x96xf32>
    %636 = vector.extract_strided_slice %602 {offsets = [0, 96], sizes = [4, 96], strides = [1, 1]} : vector<4x192xf32> to vector<4x96xf32>
    %637 = vector.extract_strided_slice %635 {offsets = [0, 0], sizes = [4, 32], strides = [1, 1]} : vector<4x96xf32> to vector<4x32xf32>
    %638 = vector.extract_strided_slice %636 {offsets = [0, 0], sizes = [4, 32], strides = [1, 1]} : vector<4x96xf32> to vector<4x32xf32>
    %639 = arith.addf %637, %638 : vector<4x32xf32>
    %640 = arith.negf %639 : vector<4x32xf32>
    %641 = math.exp %640 : vector<4x32xf32>
    %cst_143 = arith.constant 1.000000e+00 : f32
    %642 = vector.broadcast %cst_143 : f32 to vector<4x32xf32>
    %643 = arith.addf %642, %641 : vector<4x32xf32>
    %644 = arith.divf %642, %643 : vector<4x32xf32>
    %645 = vector.extract_strided_slice %635 {offsets = [0, 32], sizes = [4, 32], strides = [1, 1]} : vector<4x96xf32> to vector<4x32xf32>
    %646 = vector.extract_strided_slice %636 {offsets = [0, 32], sizes = [4, 32], strides = [1, 1]} : vector<4x96xf32> to vector<4x32xf32>
    %647 = arith.addf %645, %646 : vector<4x32xf32>
    %648 = arith.negf %647 : vector<4x32xf32>
    %649 = math.exp %648 : vector<4x32xf32>
    %cst_144 = arith.constant 1.000000e+00 : f32
    %650 = vector.broadcast %cst_144 : f32 to vector<4x32xf32>
    %651 = arith.addf %650, %649 : vector<4x32xf32>
    %652 = arith.divf %650, %651 : vector<4x32xf32>
    %653 = vector.extract_strided_slice %635 {offsets = [0, 64], sizes = [4, 32], strides = [1, 1]} : vector<4x96xf32> to vector<4x32xf32>
    %654 = vector.extract_strided_slice %636 {offsets = [0, 64], sizes = [4, 32], strides = [1, 1]} : vector<4x96xf32> to vector<4x32xf32>
    %655 = arith.mulf %644, %654 : vector<4x32xf32>
    %656 = arith.addf %653, %655 : vector<4x32xf32>
    %657 = math.tanh %656 : vector<4x32xf32>
    %cst_145 = arith.constant 1.000000e+00 : f32
    %658 = vector.broadcast %cst_145 : f32 to vector<4x32xf32>
    %659 = arith.subf %658, %652 : vector<4x32xf32>
    %660 = arith.mulf %659, %657 : vector<4x32xf32>
    %661 = arith.mulf %652, %599 : vector<4x32xf32>
    %662 = arith.addf %660, %661 : vector<4x32xf32>
    %663 = arith.index_cast %c6_i32 : i32 to index
    %c0_146 = arith.constant 0 : index
    %c0_147 = arith.constant 0 : index
    %664 = vector.load %arg2[%663, %c0_146, %c0_147] : memref<8x4x1xf32, #tpu.memory_space<vmem>>, vector<1x4x1xf32>
    %665 = vector.shape_cast %664 : vector<1x4x1xf32> to vector<4x1xf32>
    %666 = arith.index_cast %597 : i32 to index
    %c0_148 = arith.constant 0 : index
    %c0_149 = arith.constant 0 : index
    %667 = vector.load %arg2[%666, %c0_148, %c0_149] : memref<8x4x1xf32, #tpu.memory_space<vmem>>, vector<1x4x1xf32>
    %668 = vector.shape_cast %667 : vector<1x4x1xf32> to vector<4x1xf32>
    %669 = vector.broadcast %665 : vector<4x1xf32> to vector<4x32xf32>
    %670 = arith.mulf %669, %632 : vector<4x32xf32>
    %671 = arith.index_cast %c6_i32 : i32 to index
    %c0_150 = arith.constant 0 : index
    %c0_151 = arith.constant 0 : index
    %672 = vector.load %arg6[%671, %c0_150, %c0_151] : memref<8x4x64xf32, #tpu.memory_space<vmem>>, vector<1x4x32xf32>
    %673 = vector.shape_cast %672 : vector<1x4x32xf32> to vector<4x32xf32>
    %674 = vector.shape_cast %670 : vector<4x32xf32> to vector<1x4x32xf32>
    tpu.vector_store %arg6[%671, %c0_150, %c0_151], %674 {strides = array<i32>} : memref<8x4x64xf32, #tpu.memory_space<vmem>>, vector<1x4x32xf32>,
    %675 = vector.broadcast %668 : vector<4x1xf32> to vector<4x32xf32>
    %676 = arith.mulf %675, %662 : vector<4x32xf32>
    %677 = arith.index_cast %597 : i32 to index
    %c0_152 = arith.constant 0 : index
    %c32_153 = arith.constant 32 : index
    %678 = vector.load %arg6[%677, %c0_152, %c32_153] : memref<8x4x64xf32, #tpu.memory_space<vmem>>, vector<1x4x32xf32>
    %679 = vector.shape_cast %678 : vector<1x4x32xf32> to vector<4x32xf32>
    %680 = vector.shape_cast %676 : vector<4x32xf32> to vector<1x4x32xf32>
    tpu.vector_store %arg6[%677, %c0_152, %c32_153], %680 {strides = array<i32>} : memref<8x4x64xf32, #tpu.memory_space<vmem>>, vector<1x4x32xf32>,
    %681 = vector.broadcast %665 : vector<4x1xf32> to vector<4x32xf32>
    %682 = arith.mulf %681, %632 : vector<4x32xf32>
    %cst_154 = arith.constant 1.000000e+00 : f32
    %683 = vector.broadcast %cst_154 : f32 to vector<4x1xf32>
    %684 = arith.subf %683, %665 : vector<4x1xf32>
    %685 = vector.broadcast %684 : vector<4x1xf32> to vector<4x32xf32>
    %686 = arith.mulf %685, %598 : vector<4x32xf32>
    %687 = arith.addf %682, %686 : vector<4x32xf32>
    %688 = vector.broadcast %668 : vector<4x1xf32> to vector<4x32xf32>
    %689 = arith.mulf %688, %662 : vector<4x32xf32>
    %cst_155 = arith.constant 1.000000e+00 : f32
    %690 = vector.broadcast %cst_155 : f32 to vector<4x1xf32>
    %691 = arith.subf %690, %668 : vector<4x1xf32>
    %692 = vector.broadcast %691 : vector<4x1xf32> to vector<4x32xf32>
    %693 = arith.mulf %692, %599 : vector<4x32xf32>
    %694 = arith.addf %689, %693 : vector<4x32xf32>
    %695 = tpu.concatenate %687, %694 in 1 : vector<4x32xf32>, vector<4x32xf32> -> vector<4x64xf32>
    %c7_i32_156 = arith.constant 7 : i32
    %c7_i32_157 = arith.constant 7 : i32
    %696 = arith.subi %c7_i32_157, %c7_i32_156 : i32
    %697 = vector.extract_strided_slice %695 {offsets = [0, 0], sizes = [4, 32], strides = [1, 1]} : vector<4x64xf32> to vector<4x32xf32>
    %698 = vector.extract_strided_slice %695 {offsets = [0, 32], sizes = [4, 32], strides = [1, 1]} : vector<4x64xf32> to vector<4x32xf32>
    %cst_158 = arith.constant dense<0.000000e+00> : vector<4x192xf32>
    %699 = tpu.matmul %695, %0, %cst_158 {dimension_numbers = #tpu.dot_dimension_numbers<[1], [0], [0], [1], [0, 0, 1, 1], [], []>} : vector<4x64xf32>, vector<64x192xf32>, vector<4x192xf32> -> vector<4x192xf32>
    %700 = vector.broadcast %1 : vector<1x192xf32> to vector<4x192xf32>
    %701 = arith.addf %699, %700 : vector<4x192xf32>
    %702 = arith.index_cast %c7_i32_156 : i32 to index
    %c0_159 = arith.constant 0 : index
    %c0_160 = arith.constant 0 : index
    %703 = vector.load %arg0[%702, %c0_159, %c0_160] : memref<8x4x96xf32, #tpu.memory_space<vmem>>, vector<1x4x96xf32>
    %704 = vector.shape_cast %703 : vector<1x4x96xf32> to vector<4x96xf32>
    %705 = vector.extract_strided_slice %701 {offsets = [0, 0], sizes = [4, 96], strides = [1, 1]} : vector<4x192xf32> to vector<4x96xf32>
    %706 = vector.extract_strided_slice %704 {offsets = [0, 0], sizes = [4, 32], strides = [1, 1]} : vector<4x96xf32> to vector<4x32xf32>
    %707 = vector.extract_strided_slice %705 {offsets = [0, 0], sizes = [4, 32], strides = [1, 1]} : vector<4x96xf32> to vector<4x32xf32>
    %708 = arith.addf %706, %707 : vector<4x32xf32>
    %709 = arith.negf %708 : vector<4x32xf32>
    %710 = math.exp %709 : vector<4x32xf32>
    %cst_161 = arith.constant 1.000000e+00 : f32
    %711 = vector.broadcast %cst_161 : f32 to vector<4x32xf32>
    %712 = arith.addf %711, %710 : vector<4x32xf32>
    %713 = arith.divf %711, %712 : vector<4x32xf32>
    %714 = vector.extract_strided_slice %704 {offsets = [0, 32], sizes = [4, 32], strides = [1, 1]} : vector<4x96xf32> to vector<4x32xf32>
    %715 = vector.extract_strided_slice %705 {offsets = [0, 32], sizes = [4, 32], strides = [1, 1]} : vector<4x96xf32> to vector<4x32xf32>
    %716 = arith.addf %714, %715 : vector<4x32xf32>
    %717 = arith.negf %716 : vector<4x32xf32>
    %718 = math.exp %717 : vector<4x32xf32>
    %cst_162 = arith.constant 1.000000e+00 : f32
    %719 = vector.broadcast %cst_162 : f32 to vector<4x32xf32>
    %720 = arith.addf %719, %718 : vector<4x32xf32>
    %721 = arith.divf %719, %720 : vector<4x32xf32>
    %722 = vector.extract_strided_slice %704 {offsets = [0, 64], sizes = [4, 32], strides = [1, 1]} : vector<4x96xf32> to vector<4x32xf32>
    %723 = vector.extract_strided_slice %705 {offsets = [0, 64], sizes = [4, 32], strides = [1, 1]} : vector<4x96xf32> to vector<4x32xf32>
    %724 = arith.mulf %713, %723 : vector<4x32xf32>
    %725 = arith.addf %722, %724 : vector<4x32xf32>
    %726 = math.tanh %725 : vector<4x32xf32>
    %cst_163 = arith.constant 1.000000e+00 : f32
    %727 = vector.broadcast %cst_163 : f32 to vector<4x32xf32>
    %728 = arith.subf %727, %721 : vector<4x32xf32>
    %729 = arith.mulf %728, %726 : vector<4x32xf32>
    %730 = arith.mulf %721, %697 : vector<4x32xf32>
    %731 = arith.addf %729, %730 : vector<4x32xf32>
    %732 = arith.index_cast %696 : i32 to index
    %c0_164 = arith.constant 0 : index
    %c0_165 = arith.constant 0 : index
    %733 = vector.load %arg1[%732, %c0_164, %c0_165] : memref<8x4x96xf32, #tpu.memory_space<vmem>>, vector<1x4x96xf32>
    %734 = vector.shape_cast %733 : vector<1x4x96xf32> to vector<4x96xf32>
    %735 = vector.extract_strided_slice %701 {offsets = [0, 96], sizes = [4, 96], strides = [1, 1]} : vector<4x192xf32> to vector<4x96xf32>
    %736 = vector.extract_strided_slice %734 {offsets = [0, 0], sizes = [4, 32], strides = [1, 1]} : vector<4x96xf32> to vector<4x32xf32>
    %737 = vector.extract_strided_slice %735 {offsets = [0, 0], sizes = [4, 32], strides = [1, 1]} : vector<4x96xf32> to vector<4x32xf32>
    %738 = arith.addf %736, %737 : vector<4x32xf32>
    %739 = arith.negf %738 : vector<4x32xf32>
    %740 = math.exp %739 : vector<4x32xf32>
    %cst_166 = arith.constant 1.000000e+00 : f32
    %741 = vector.broadcast %cst_166 : f32 to vector<4x32xf32>
    %742 = arith.addf %741, %740 : vector<4x32xf32>
    %743 = arith.divf %741, %742 : vector<4x32xf32>
    %744 = vector.extract_strided_slice %734 {offsets = [0, 32], sizes = [4, 32], strides = [1, 1]} : vector<4x96xf32> to vector<4x32xf32>
    %745 = vector.extract_strided_slice %735 {offsets = [0, 32], sizes = [4, 32], strides = [1, 1]} : vector<4x96xf32> to vector<4x32xf32>
    %746 = arith.addf %744, %745 : vector<4x32xf32>
    %747 = arith.negf %746 : vector<4x32xf32>
    %748 = math.exp %747 : vector<4x32xf32>
    %cst_167 = arith.constant 1.000000e+00 : f32
    %749 = vector.broadcast %cst_167 : f32 to vector<4x32xf32>
    %750 = arith.addf %749, %748 : vector<4x32xf32>
    %751 = arith.divf %749, %750 : vector<4x32xf32>
    %752 = vector.extract_strided_slice %734 {offsets = [0, 64], sizes = [4, 32], strides = [1, 1]} : vector<4x96xf32> to vector<4x32xf32>
    %753 = vector.extract_strided_slice %735 {offsets = [0, 64], sizes = [4, 32], strides = [1, 1]} : vector<4x96xf32> to vector<4x32xf32>
    %754 = arith.mulf %743, %753 : vector<4x32xf32>
    %755 = arith.addf %752, %754 : vector<4x32xf32>
    %756 = math.tanh %755 : vector<4x32xf32>
    %cst_168 = arith.constant 1.000000e+00 : f32
    %757 = vector.broadcast %cst_168 : f32 to vector<4x32xf32>
    %758 = arith.subf %757, %751 : vector<4x32xf32>
    %759 = arith.mulf %758, %756 : vector<4x32xf32>
    %760 = arith.mulf %751, %698 : vector<4x32xf32>
    %761 = arith.addf %759, %760 : vector<4x32xf32>
    %762 = arith.index_cast %c7_i32_156 : i32 to index
    %c0_169 = arith.constant 0 : index
    %c0_170 = arith.constant 0 : index
    %763 = vector.load %arg2[%762, %c0_169, %c0_170] : memref<8x4x1xf32, #tpu.memory_space<vmem>>, vector<1x4x1xf32>
    %764 = vector.shape_cast %763 : vector<1x4x1xf32> to vector<4x1xf32>
    %765 = arith.index_cast %696 : i32 to index
    %c0_171 = arith.constant 0 : index
    %c0_172 = arith.constant 0 : index
    %766 = vector.load %arg2[%765, %c0_171, %c0_172] : memref<8x4x1xf32, #tpu.memory_space<vmem>>, vector<1x4x1xf32>
    %767 = vector.shape_cast %766 : vector<1x4x1xf32> to vector<4x1xf32>
    %768 = vector.broadcast %764 : vector<4x1xf32> to vector<4x32xf32>
    %769 = arith.mulf %768, %731 : vector<4x32xf32>
    %770 = arith.index_cast %c7_i32_156 : i32 to index
    %c0_173 = arith.constant 0 : index
    %c0_174 = arith.constant 0 : index
    %771 = vector.load %arg6[%770, %c0_173, %c0_174] : memref<8x4x64xf32, #tpu.memory_space<vmem>>, vector<1x4x32xf32>
    %772 = vector.shape_cast %771 : vector<1x4x32xf32> to vector<4x32xf32>
    %773 = vector.shape_cast %769 : vector<4x32xf32> to vector<1x4x32xf32>
    tpu.vector_store %arg6[%770, %c0_173, %c0_174], %773 {strides = array<i32>} : memref<8x4x64xf32, #tpu.memory_space<vmem>>, vector<1x4x32xf32>,
    %774 = vector.broadcast %767 : vector<4x1xf32> to vector<4x32xf32>
    %775 = arith.mulf %774, %761 : vector<4x32xf32>
    %776 = arith.index_cast %696 : i32 to index
    %c0_175 = arith.constant 0 : index
    %c32_176 = arith.constant 32 : index
    %777 = vector.load %arg6[%776, %c0_175, %c32_176] : memref<8x4x64xf32, #tpu.memory_space<vmem>>, vector<1x4x32xf32>
    %778 = vector.shape_cast %777 : vector<1x4x32xf32> to vector<4x32xf32>
    %779 = vector.shape_cast %775 : vector<4x32xf32> to vector<1x4x32xf32>
    tpu.vector_store %arg6[%776, %c0_175, %c32_176], %779 {strides = array<i32>} : memref<8x4x64xf32, #tpu.memory_space<vmem>>, vector<1x4x32xf32>,
    %780 = vector.broadcast %764 : vector<4x1xf32> to vector<4x32xf32>
    %781 = arith.mulf %780, %731 : vector<4x32xf32>
    %cst_177 = arith.constant 1.000000e+00 : f32
    %782 = vector.broadcast %cst_177 : f32 to vector<4x1xf32>
    %783 = arith.subf %782, %764 : vector<4x1xf32>
    %784 = vector.broadcast %783 : vector<4x1xf32> to vector<4x32xf32>
    %785 = arith.mulf %784, %697 : vector<4x32xf32>
    %786 = arith.addf %781, %785 : vector<4x32xf32>
    %787 = vector.broadcast %767 : vector<4x1xf32> to vector<4x32xf32>
    %788 = arith.mulf %787, %761 : vector<4x32xf32>
    %cst_178 = arith.constant 1.000000e+00 : f32
    %789 = vector.broadcast %cst_178 : f32 to vector<4x1xf32>
    %790 = arith.subf %789, %767 : vector<4x1xf32>
    %791 = vector.broadcast %790 : vector<4x1xf32> to vector<4x32xf32>
    %792 = arith.mulf %791, %698 : vector<4x32xf32>
    %793 = arith.addf %788, %792 : vector<4x32xf32>
    %794 = tpu.concatenate %786, %793 in 1 : vector<4x32xf32>, vector<4x32xf32> -> vector<4x64xf32>
    %c8_i32 = arith.constant 8 : i32
    %c0_179 = arith.constant 0 : index
    %c0_180 = arith.constant 0 : index
    %795 = vector.load %arg7[%c0_179, %c0_180] : memref<4x64xf32, #tpu.memory_space<vmem>>, vector<4x64xf32>
    tpu.vector_store %arg7[%c0_179, %c0_180], %794 {strides = array<i32>} : memref<4x64xf32, #tpu.memory_space<vmem>>, vector<4x64xf32>,
    return
  }
}

</mosaic_0001>

<bundles_post_ra>
// kernel: encoder_forward.2
= control target key start
LH: loop header
LB: loop body
LE: loop exit
PB: predicated region body
PF: predicated region fallthrough
CT: control target
= control target key end

     0   :  { %v1832_v3 = vmov 0.0   ;;  %vm54_vm0 = vcmask 523264   ;;  %v44_v18 = vlaneseq  ;;  %v1833_v26 = vmov 0   ;;  %s1834_s13 = smov 64   ;;  %s1836_s16 = smov 32   ;;  %s2520_s4 = inlined_call_operand.vmem [shape: f32[64,192], index: 4, kind: input, shape index: {}]   ;;  %s2521_s3 = inlined_call_operand.vmem [shape: f32[4,64], index: 3, kind: input, shape index: {}]   ;;  %s2522_s5 = inlined_call_operand.vmem [shape: f32[1,192], index: 5, kind: input, shape index: {}]   ;;  %s2523_s2 = inlined_call_operand.vmem [shape: f32[8,4,1], index: 2, kind: input, shape index: {}]   ;;  %s2524_s0 = inlined_call_operand.vmem [shape: f32[8,4,96], index: 0, kind: input, shape index: {}]   ;;  %s2525_s1 = inlined_call_operand.vmem [shape: f32[8,4,96], index: 1, kind: input, shape index: {}]   ;;  %s2526_s6 = inlined_call_operand.vmem [shape: f32[8,4,64], index: 6, kind: output, shape index: {0}]   ;;  %s2527_s7 = inlined_call_operand.vmem [shape: f32[4,64], index: 7, kind: output, shape index: {1}]  }
   0x1   :  { %v1880_v0 = vld [vmem:[%s2520_s4 + $0x78] sm:$0xff]  ;;  %v1885_v1 = vld [vmem:[%s2520_s4 + $0x70] sm:$0xff]  ;;  %v1890_v2 = vld [vmem:[%s2520_s4 + $0x68] sm:$0xff]  ;;  %122 = vmatprep.mubr.f32.mxu0 %v1832_v3  ;;  %317 = vmatprep.mubr.f32.mxu1 %v1832_v3  ;;  %vm222_vm1 = vcmask 519424   ;;  %vm248_vm2 = vcmask 261120   ;;  %vm213_vm3 = vcmask 257024  }
   0x2   :  { %74 = vmatprep.subr.mxu0 %v1880_v0  ;;  %v1898_v4 = vld [vmem:[%s2520_s4 + $0x60] sm:$0xff]  ;;  %269 = vmatprep.subr.mxu1 %v1880_v0  ;;  %v1905_v5 = vld [vmem:[%s2520_s4 + $0x58] sm:$0xff]  ;;  %v1912_v6 = vld [vmem:[%s2520_s4 + $0x50] sm:$0xff]  ;;  %v45_v19 = vshrl.u32 %v44_v18, 7  ;;  %vm1598_vm4 = vcmask 519168  }
   0x3   :  { %75 = vmatpush1.msra.mxu0 %v1885_v1  ;;  %270 = vmatpush1.msra.mxu1 %v1885_v1  ;;  %v1919_v7 = vld [vmem:[%s2520_s4 + $0x48] sm:$0xff]  ;;  %v1926_v8 = vld [vmem:[%s2520_s4 + $0x40] sm:$0xff]  ;;  %v1933_v9 = vld [vmem:[%s2520_s4 + $0x38] sm:$0xff] }
   0x4   :  { %76 = vmatprep.subr.mxu0 %v1890_v2  ;;  %271 = vmatprep.subr.mxu1 %v1890_v2  ;;  %v1940_v10 = vld [vmem:[%s2520_s4 + $0x30] sm:$0xff]  ;;  %v1947_v11 = vld [vmem:[%s2520_s4 + $0x28] sm:$0xff]  ;;  %v1954_v12 = vld [vmem:[%s2520_s4 + $0x20] sm:$0xff]  ;;  %v46_v20 = vsub.s32 0, %v45_v19  ;;  %v50_v22 = vsub.s32 1, %v45_v19 }
   0x5   :  { %77 = vmatpush1.msra.mxu0 %v1898_v4  ;;  %272 = vmatpush1.msra.mxu1 %v1898_v4  ;;  %v1961_v13 = vld [vmem:[%s2520_s4 + $0x18] sm:$0xff]  ;;  %v1968_v14 = vld [vmem:[%s2520_s4 + $0x10] sm:$0xff]  ;;  %v1975_v15 = vld [vmem:[%s2520_s4 + $0x8] sm:$0xff] }
   0x6   :  { %78 = vmatprep.subr.mxu0 %v1905_v5  ;;  %273 = vmatprep.subr.mxu1 %v1905_v5  ;;  %v1982_v16 = vld [vmem:[%s2520_s4] sm:$0xff]  ;;  %v1610_v40 = vld [vmem:[%s2525_s1 + $0x1c] sm:$0xf] }
   0x7   :  { %79 = vmatpush1.msra.mxu0 %v1912_v6  ;;  %274 = vmatpush1.msra.mxu1 %v1912_v6  ;;  %v1989_v17 = vld [vmem:[%s2521_s3] sm:$0xf]  ;;  %v1613_v49 = vld [vmem:[%s2523_s2 + $0x1c] sm:$0xf] }
   0x8   :  { %80 = vmatprep.subr.mxu0 %v1919_v7  ;;  %275 = vmatprep.subr.mxu1 %v1919_v7  ;;  %v41_v21 = vld [vmem:[%s2522_s5] sm:$0x3]  ;;  %s1835_s5 = smov 96   ;;  %v236_v50 = vsub.f32 1.0, %v1613_v49 }
   0x9   :  { %81 = vmatpush1.msra.mxu0 %v1926_v8  ;;  %276 = vmatpush1.msra.mxu1 %v1926_v8  ;;  %v2020_v23 = vrot.slane %v41_v21, %v46_v20  ;;  %v2022_v24 = vrot.slane %v41_v21, %v50_v22  ;;  %v200_v30 = vld [vmem:[%s2523_s2] sm:$0xf] }
   0xa   :  { %82 = vmatprep.subr.mxu0 %v1933_v9  ;;  %277 = vmatprep.subr.mxu1 %v1933_v9  ;;  %v224_v31 = vsub.f32 1.0, %v200_v30  ;;  %v129_v32 = vld [vmem:[%s2524_s0] sm:$0xf] }
   0xb   :  { %83 = vmatpush1.msra.mxu0 %v1940_v10  ;;  %278 = vmatpush1.msra.mxu1 %v1940_v10 }
   0xc   :  { %84 = vmatprep.subr.mxu0 %v1947_v11  ;;  %279 = vmatprep.subr.mxu1 %v1947_v11 }
   0xd   :  { %85 = vmatpush1.msra.mxu0 %v1954_v12  ;;  %280 = vmatpush1.msra.mxu1 %v1954_v12 }
   0xe   :  { %86 = vmatprep.subr.mxu0 %v1961_v13  ;;  %281 = vmatprep.subr.mxu1 %v1961_v13 }
   0xf   :  { %87 = vmatpush1.msra.mxu0 %v1968_v14  ;;  %282 = vmatpush1.msra.mxu1 %v1968_v14 }
  0x10   :  { %88 = vmatprep.subr.mxu0 %v1975_v15  ;;  %283 = vmatprep.subr.mxu1 %v1975_v15 }
  0x11   :  { %89 = vmatpush1.msra.mxu0 %v1982_v16  ;;  %284 = vmatpush1.msra.mxu1 %v1982_v16 }
  0x12   :  { %1608 = vmatmul.mubr.msk.f32.vlgmr.msra.gmra.mxu0 %vm54_vm0, %v1989_v17  ;;  %464 = vmatprep.subr.mxu0 %v1880_v0 }
  0x13   :  { %465 = vmatpush1.msra.mxu0 %v1885_v1  ;;  %512 = vmatprep.mubr.f32.mxu0 %v1832_v3 }
  0x14   :  { %466 = vmatprep.subr.mxu0 %v1890_v2  ;;  %659 = vmatprep.subr.mxu1 %v1880_v0 }
  0x15   :  { %467 = vmatpush1.msra.mxu0 %v1898_v4  ;;  %1687 = vset.pattern.permute.xlu0 %v1833_v26 }
  0x16   :  { %468 = vmatprep.subr.mxu0 %v1905_v5  ;;  %1688 = vset.pattern.permute.xlu1 %v1833_v26 }
  0x17   :  { %469 = vmatpush1.msra.mxu0 %v1912_v6 }
  0x18   :  { %470 = vmatprep.subr.mxu0 %v1919_v7 }
  0x19   :  { %471 = vmatpush1.msra.mxu0 %v1926_v8 }
  0x1a   :  { %472 = vmatprep.subr.mxu0 %v1933_v9 }
  0x1b   :  { %473 = vmatpush1.msra.mxu0 %v1940_v10 }
  0x1c   :  { %474 = vmatprep.subr.mxu0 %v1947_v11 }
  0x1d   :  { %475 = vmatpush1.msra.mxu0 %v1954_v12 }
  0x1e   :  { %476 = vmatprep.subr.mxu0 %v1961_v13 }
  0x1f   :  { %477 = vmatpush1.msra.mxu0 %v1968_v14 }
  0x20   :  { %478 = vmatprep.subr.mxu0 %v1975_v15 }
  0x21   :  { %479 = vmatpush1.msra.mxu0 %v1982_v16 }
  0x22   :  { %854 = vmatprep.subr.mxu0 %v1880_v0 }
  0xd2   :  { %v124_v25 = vpop.f32.mrf.mxu0 }
  0xd3   :  { %v125_v27 = vadd.f32 %v124_v25, %v2020_v23 }
  0xd4   :  { %v126_v28 = vpop.f32.mrf.mxu0 }
  0xd5   :  { %v127_v29 = vadd.f32 %v126_v28, %v2022_v24  ;;  %138 = vrot.lane.b32.xlu0 %v125_v27, %s1834_s13  ;;  %v130_v33 = vadd.f32 %v129_v32, %v125_v27 }
  0xd7   :  { %182 = vrot.lane.b32.xlu1 %v127_v29, %s1835_s5  ;;  %v1609_v34 = vmul.f32 -1.442695, %v130_v33 }
  0xd9   :  { %161 = vrot.lane.b32.xlu0 %v125_v27, %s1836_s16  ;;  %1689 = vpow2.f32 %v1609_v34 }
  0xdd   :  { %227 = vperm.xlu0 %1687, %v224_v31  }
  0xe6   :  { %v1690_v35 = vpop.eup %1689 }
  0xe7   :  { %v134_v36 = vadd.f32 1.0, %v1690_v35 }
  0xe9   :  { %1691 = vrcp.f32 %v134_v36 }
  0xf6   :  { %v1692_v37 = vpop.eup %1691 }
  0xf7   :  { %v148_v18 = vsub.f32 1.0, %v1692_v37 }
 0x147   :  { %v139_v38 = vpop.permute.xlu0 %138 }
 0x148   :  { %v141_v39 = vmul.f32 %v1692_v37, %v139_v38 }
 0x149   :  { %v183_v47 = vpop.permute.xlu1 %182 }
 0x14a   :  { %143 = vrot.lane.b32.xlu1 %v141_v39, %s1834_s13 }
 0x14b   :  { %v162_v41 = vpop.permute.xlu0 %161 }
 0x14c   :  { %v164_v42 = vadd.f32 %v1610_v40, %v162_v41 }
 0x14e   :  { %v1611_v43 = vmul.f32 -1.442695, %v164_v42 }
 0x150   :  { %1693 = vpow2.f32 %v1611_v43 }
 0x158   :  { %v228_v53 = vpop.permute.xlu0 %227 }
 0x159   :  { %v230_v55 = vmul.f32 %v228_v53, %v1989_v17 }
 0x15d   :  { %v1694_v44 = vpop.eup %1693 }
 0x15e   :  { %v168_v45 = vadd.f32 1.0, %v1694_v44 }
 0x160   :  { %1695 = vrcp.f32 %v168_v45  ;;  %v1621_v45 = vld [vmem:[%s2523_s2 + $0x4] sm:$0xf] }
 0x16d   :  { %v1696_v46 = vpop.eup %1695 }
 0x16e   :  { %v185_v48 = vmul.f32 %v1696_v46, %v183_v47  ;;  %v420_v47 = vsub.f32 1.0, %v1621_v45 }
 0x170   :  { %187 = vrot.lane.b32.xlu1 %v185_v48, %s1834_s13  ;;  %v1622_v48 = vld [vmem:[%s2523_s2 + $0x18] sm:$0xf] }
 0x174   :  { %205 = vperm.xlu1 %1688, %v200_v30  }
 0x178   :  { %154 = vrot.lane.b32.xlu1 %v1989_v17, %s1836_s16 }
 0x17c   :  { %172 = vrot.lane.b32.xlu1 %v127_v29, %s1836_s16 }
 0x180   :  { %239 = vperm.xlu1 %1688, %v236_v50   ;;  %v1616_v50 = vld [vmem:[%s2524_s0 + $0x4] sm:$0xf] }
 0x1bc   :  { %v144_v51 = vpop.permute.xlu1 %143 }
 0x1bd   :  { %v146_v52 = vadd.f32 %v144_v51, %v129_v32 }
 0x1bf   :  { %1697 = vtanh.f32 %v146_v52 }
 0x1cc   :  { %v1698_v54 = vpop.eup %1697 }
 0x1cd   :  { %150 = vrot.lane.b32.xlu0 %v1698_v54, %s1835_s5 }
 0x1d1   :  { %232 = vrot.lane.b32.xlu0 %v230_v55, %s1836_s16  ;;  %v1618_v55 = vld [vmem:[%s2525_s1 + $0x18] sm:$0xf] }
 0x1d5   :  { %217 = vperm.xlu0 %1687, %v1613_v49   ;;  %v432_v49 = vsub.f32 1.0, %v1622_v48 }
 0x1e2   :  { %v188_v56 = vpop.permute.xlu1 %187 }
 0x1e3   :  { %v190_v57 = vadd.f32 %v1610_v40, %v188_v56 }
 0x1e5   :  { %1699 = vtanh.f32 %v190_v57 }
 0x1ef   :  { %v206_v59 = vpop.permute.xlu1 %205 }
 0x1f2   :  { %v1700_v58 = vpop.eup %1699 }
 0x1f3   :  { %194 = vrot.lane.b32.xlu0 %v1700_v58, %s1835_s5  ;;  %v155_v60 = vpop.permute.xlu1 %154 }
 0x1f4   :  { %v157_v20 = vmul.f32 %v1692_v37, %v155_v60 }
 0x1f7   :  { %v173_v61 = vpop.permute.xlu1 %172 }
 0x1f8   :  { %v175_v62 = vadd.f32 %v1610_v40, %v173_v61 }
 0x1fa   :  { %v1612_v63 = vmul.f32 -1.442695, %v175_v62 }
 0x1fb   :  { %v240_v38 = vpop.permute.xlu1 %239 }
 0x1fc   :  { %1701 = vpow2.f32 %v1612_v63  ;;  %v242_v39 = vmul.f32 %v240_v38, %v1989_v17 }
 0x209   :  { %v1702_v28 = vpop.eup %1701 }
 0x20a   :  { %v179_v29 = vadd.f32 1.0, %v1702_v28 }
 0x20c   :  { %1703 = vrcp.f32 %v179_v29 }
 0x219   :  { %v1704_v30 = vpop.eup %1703 }
 0x21a   :  { %v192_v32 = vsub.f32 1.0, %v1704_v30  ;;  %v198_v35 = vmul.f32 %v1704_v30, %v1989_v17 }
 0x23f   :  { %v151_v19 = vpop.permute.xlu0 %150 }
 0x240   :  { %v153_v21 = vmul.f32 %v151_v19, %v148_v18 }
 0x242   :  { %v158_v22 = vadd.f32 %v157_v20, %v153_v21 }
 0x243   :  { %v233_v25 = vpop.permute.xlu0 %232 }
 0x244   :  { %v2050_v26 = vmul.f32 %v206_v59, %v158_v22 }
 0x246   :  { %v235_v27 = vadd.f32 %v233_v25, %v2050_v26 }
 0x248   :  { %245 = vrot.lane.b32.xlu1 %v235_v27, %s1835_s5 }
 0x250   :  { %v218_v31 = vpop.permute.xlu0 %217 }
 0x265   :  { %v195_v33 = vpop.permute.xlu0 %194 }
 0x266   :  { %v197_v34 = vmul.f32 %v195_v33, %v192_v32 }
 0x268   :  { %v199_v36 = vadd.f32 %v198_v35, %v197_v34 }
 0x26a   :  { %v220_v37 = vmul.f32 %v218_v31, %v199_v36 }
 0x26c   :  { %1614 = vst.msk [vmem:[%s2526_s6 + $0x1c] sm:$0xf] %vm222_vm1, %v220_v37  ;;  %v243_v40 = vadd.f32 %v242_v39, %v220_v37 }
 0x2ba   :  { %v246_v41 = vpop.permute.xlu1 %245 }
 0x2bb   :  { %v2061_v42 = vsel %vm248_vm2, %v246_v41, %v243_v40 }
 0x2bc   :  { %1615 = vmatmul.mubr.msk.f32.vlgmr.msra.gmra.mxu1 %vm54_vm0, %v2061_v42 }
 0x2bd   :  { %660 = vmatpush1.msra.mxu1 %v1885_v1  ;;  %707 = vmatprep.mubr.f32.mxu1 %v1832_v3 }
 0x2be   :  { %661 = vmatprep.subr.mxu1 %v1890_v2 }
 0x2bf   :  { %662 = vmatpush1.msra.mxu1 %v1898_v4 }
 0x2c0   :  { %663 = vmatprep.subr.mxu1 %v1905_v5 }
 0x2c1   :  { %664 = vmatpush1.msra.mxu1 %v1912_v6 }
 0x2c2   :  { %665 = vmatprep.subr.mxu1 %v1919_v7 }
 0x2c3   :  { %666 = vmatpush1.msra.mxu1 %v1926_v8 }
 0x2c4   :  { %667 = vmatprep.subr.mxu1 %v1933_v9 }
 0x2c5   :  { %668 = vmatpush1.msra.mxu1 %v1940_v10 }
 0x2c6   :  { %669 = vmatprep.subr.mxu1 %v1947_v11 }
 0x2c7   :  { %670 = vmatpush1.msra.mxu1 %v1954_v12 }
 0x2c8   :  { %671 = vmatprep.subr.mxu1 %v1961_v13 }
 0x2c9   :  { %672 = vmatpush1.msra.mxu1 %v1968_v14 }
 0x2ca   :  { %673 = vmatprep.subr.mxu1 %v1975_v15 }
 0x2cb   :  { %674 = vmatpush1.msra.mxu1 %v1982_v16 }
 0x2cc   :  { %1045 = vmatprep.subr.mxu1 %v1880_v0 }
 0x37c   :  { %v319_v17 = vpop.f32.mrf.mxu1 }
 0x37d   :  { %v320_v43 = vadd.f32 %v319_v17, %v2020_v23 }
 0x37e   :  { %v321_v44 = vpop.f32.mrf.mxu1 }
 0x37f   :  { %357 = vrot.lane.b32.xlu1 %v320_v43, %s1836_s16  ;;  %334 = vrot.lane.b32.xlu0 %v320_v43, %s1834_s13  ;;  %v322_v46 = vadd.f32 %v321_v44, %v2022_v24  ;;  %v326_v51 = vadd.f32 %v1616_v50, %v320_v43 }
 0x381   :  { %v1617_v52 = vmul.f32 -1.442695, %v326_v51 }
 0x383   :  { %378 = vrot.lane.b32.xlu0 %v322_v46, %s1835_s5  ;;  %1705 = vpow2.f32 %v1617_v52 }
 0x387   :  { %423 = vperm.xlu0 %1687, %v420_v47  }
 0x38b   :  { %402 = vperm.xlu0 %1687, %v1621_v45  }
 0x38f   :  { %350 = vrot.lane.b32.xlu0 %v2061_v42, %s1836_s16 }
 0x390   :  { %v1706_v53 = vpop.eup %1705 }
 0x391   :  { %v330_v54 = vadd.f32 1.0, %v1706_v53 }
 0x393   :  { %368 = vrot.lane.b32.xlu0 %v322_v46, %s1836_s16  ;;  %1707 = vrcp.f32 %v330_v54 }
 0x397   :  { %435 = vperm.xlu0 %1687, %v432_v49  }
 0x3a0   :  { %v1708_v56 = vpop.eup %1707 }
 0x3a1   :  { %v344_v37 = vsub.f32 1.0, %v1708_v56 }
 0x3f1   :  { %v358_v57 = vpop.permute.xlu1 %357  ;;  %v335_v58 = vpop.permute.xlu0 %334 }
 0x3f2   :  { %v360_v59 = vadd.f32 %v1618_v55, %v358_v57  ;;  %v337_v60 = vmul.f32 %v1708_v56, %v335_v58 }
 0x3f4   :  { %v1619_v61 = vmul.f32 -1.442695, %v360_v59  ;;  %339 = vrot.lane.b32.xlu1 %v337_v60, %s1834_s13 }
 0x3f5   :  { %v379_v19 = vpop.permute.xlu0 %378 }
 0x3f6   :  { %1709 = vpow2.f32 %v1619_v61 }
 0x402   :  { %v424_v27 = vpop.permute.xlu0 %423 }
 0x403   :  { %v1710_v62 = vpop.eup %1709  ;;  %v426_v28 = vmul.f32 %v424_v27, %v2061_v42 }
 0x404   :  { %v364_v63 = vadd.f32 1.0, %v1710_v62  ;;  %v1631_v62 = vld [vmem:[%s2523_s2 + $0x8] sm:$0xf] }
 0x406   :  { %1711 = vrcp.f32 %v364_v63  ;;  %v403_v32 = vpop.permute.xlu0 %402 }
 0x40a   :  { %v351_v33 = vpop.permute.xlu0 %350 }
 0x40b   :  { %v353_v39 = vmul.f32 %v1708_v56, %v351_v33 }
 0x40e   :  { %v369_v34 = vpop.permute.xlu0 %368 }
 0x40f   :  { %v371_v35 = vadd.f32 %v1618_v55, %v369_v34 }
 0x411   :  { %v1620_v36 = vmul.f32 -1.442695, %v371_v35 }
 0x413   :  { %v1712_v18 = vpop.eup %1711 }
 0x414   :  { %v381_v20 = vmul.f32 %v1712_v18, %v379_v19  ;;  %v615_v18 = vsub.f32 1.0, %v1631_v62  ;;  %v1632_v19 = vld [vmem:[%s2523_s2 + $0x14] sm:$0xf] }
 0x416   :  { %383 = vrot.lane.b32.xlu1 %v381_v20, %s1834_s13  ;;  %v627_v20 = vsub.f32 1.0, %v1632_v19 }
 0x466   :  { %v340_v21 = vpop.permute.xlu1 %339 }
 0x467   :  { %v342_v22 = vadd.f32 %v1616_v50, %v340_v21  ;;  %v1626_v21 = vld [vmem:[%s2524_s0 + $0x8] sm:$0xf] }
 0x469   :  { %1713 = vtanh.f32 %v342_v22 }
 0x476   :  { %v1714_v25 = vpop.eup %1713 }
 0x477   :  { %346 = vrot.lane.b32.xlu1 %v1714_v25, %s1835_s5 }
 0x47b   :  { %428 = vrot.lane.b32.xlu1 %v426_v28, %s1836_s16 }
 0x47f   :  { %414 = vperm.xlu1 %1688, %v1622_v48  }
 0x488   :  { %v384_v29 = vpop.permute.xlu1 %383 }
 0x489   :  { %v386_v30 = vadd.f32 %v1618_v55, %v384_v29  ;;  %v436_v55 = vpop.permute.xlu0 %435  ;;  %v1628_v29 = vld [vmem:[%s2525_s1 + $0x14] sm:$0xf] }
 0x48a   :  { %v438_v56 = vmul.f32 %v436_v55, %v2061_v42 }
 0x48b   :  { %1715 = vtanh.f32 %v386_v30 }
 0x48c   :  { %1717 = vpow2.f32 %v1620_v36 }
 0x498   :  { %v1716_v31 = vpop.eup %1715 }
 0x499   :  { %390 = vrot.lane.b32.xlu1 %v1716_v31, %s1835_s5  ;;  %v1718_v45 = vpop.eup %1717 }
 0x49a   :  { %v375_v46 = vadd.f32 1.0, %v1718_v45 }
 0x49c   :  { %1719 = vrcp.f32 %v375_v46 }
 0x4a9   :  { %v1720_v47 = vpop.eup %1719 }
 0x4aa   :  { %v388_v49 = vsub.f32 1.0, %v1720_v47  ;;  %v394_v51 = vmul.f32 %v1720_v47, %v2061_v42 }
 0x4e9   :  { %v347_v38 = vpop.permute.xlu1 %346 }
 0x4ea   :  { %v349_v40 = vmul.f32 %v347_v38, %v344_v37 }
 0x4ec   :  { %v354_v41 = vadd.f32 %v353_v39, %v349_v40 }
 0x4ed   :  { %v429_v43 = vpop.permute.xlu1 %428 }
 0x4ee   :  { %v2108_v17 = vmul.f32 %v403_v32, %v354_v41 }
 0x4f0   :  { %v431_v44 = vadd.f32 %v429_v43, %v2108_v17 }
 0x4f2   :  { %441 = vrot.lane.b32.xlu0 %v431_v44, %s1835_s5 }
 0x4fa   :  { %v415_v48 = vpop.permute.xlu1 %414 }
 0x50b   :  { %v391_v50 = vpop.permute.xlu1 %390 }
 0x50c   :  { %v393_v52 = vmul.f32 %v391_v50, %v388_v49 }
 0x50e   :  { %v395_v53 = vadd.f32 %v394_v51, %v393_v52 }
 0x510   :  { %v417_v54 = vmul.f32 %v415_v48, %v395_v53 }
 0x512   :  { %1624 = vst.msk [vmem:[%s2526_s6 + $0x18] sm:$0xf] %vm222_vm1, %v417_v54  ;;  %v439_v57 = vadd.f32 %v438_v56, %v417_v54 }
 0x564   :  { %v442_v58 = vpop.permute.xlu0 %441 }
 0x565   :  { %v2119_v59 = vsel %vm248_vm2, %v442_v58, %v439_v57 }
 0x566   :  { %1625 = vmatmul.mubr.msk.f32.vlgmr.msra.gmra.mxu0 %vm54_vm0, %v2119_v59 }
 0x567   :  { %855 = vmatpush1.msra.mxu0 %v1885_v1  ;;  %902 = vmatprep.mubr.f32.mxu0 %v1832_v3 }
 0x568   :  { %856 = vmatprep.subr.mxu0 %v1890_v2 }
 0x569   :  { %857 = vmatpush1.msra.mxu0 %v1898_v4 }
 0x56a   :  { %858 = vmatprep.subr.mxu0 %v1905_v5 }
 0x56b   :  { %859 = vmatpush1.msra.mxu0 %v1912_v6 }
 0x56c   :  { %860 = vmatprep.subr.mxu0 %v1919_v7 }
 0x56d   :  { %861 = vmatpush1.msra.mxu0 %v1926_v8 }
 0x56e   :  { %862 = vmatprep.subr.mxu0 %v1933_v9 }
 0x56f   :  { %863 = vmatpush1.msra.mxu0 %v1940_v10 }
 0x570   :  { %864 = vmatprep.subr.mxu0 %v1947_v11 }
 0x571   :  { %865 = vmatpush1.msra.mxu0 %v1954_v12 }
 0x572   :  { %866 = vmatprep.subr.mxu0 %v1961_v13 }
 0x573   :  { %867 = vmatpush1.msra.mxu0 %v1968_v14 }
 0x574   :  { %868 = vmatprep.subr.mxu0 %v1975_v15 }
 0x575   :  { %869 = vmatpush1.msra.mxu0 %v1982_v16 }
 0x576   :  { %1236 = vmatprep.subr.mxu0 %v1880_v0 }
 0x626   :  { %v514_v42 = vpop.f32.mrf.mxu0 }
 0x627   :  { %v515_v60 = vadd.f32 %v514_v42, %v2020_v23 }
 0x628   :  { %v516_v61 = vpop.f32.mrf.mxu0 }
 0x629   :  { %552 = vrot.lane.b32.xlu0 %v515_v60, %s1836_s16  ;;  %529 = vrot.lane.b32.xlu1 %v515_v60, %s1834_s13  ;;  %v517_v63 = vadd.f32 %v516_v61, %v2022_v24  ;;  %v521_v22 = vadd.f32 %v1626_v21, %v515_v60 }
 0x62b   :  { %v1627_v25 = vmul.f32 -1.442695, %v521_v22 }
 0x62d   :  { %573 = vrot.lane.b32.xlu1 %v517_v63, %s1835_s5  ;;  %1721 = vpow2.f32 %v1627_v25 }
 0x631   :  { %618 = vperm.xlu1 %1688, %v615_v18  }
 0x635   :  { %597 = vperm.xlu1 %1688, %v1631_v62  }
 0x639   :  { %545 = vrot.lane.b32.xlu1 %v2119_v59, %s1836_s16 }
 0x63a   :  { %v1722_v27 = vpop.eup %1721 }
 0x63b   :  { %v525_v28 = vadd.f32 1.0, %v1722_v27 }
 0x63d   :  { %563 = vrot.lane.b32.xlu1 %v517_v63, %s1836_s16  ;;  %1723 = vrcp.f32 %v525_v28 }
 0x641   :  { %630 = vperm.xlu1 %1688, %v627_v20  }
 0x64a   :  { %v1724_v30 = vpop.eup %1723 }
 0x64b   :  { %v539_v55 = vsub.f32 1.0, %v1724_v30 }
 0x69b   :  { %v553_v31 = vpop.permute.xlu0 %552  ;;  %v530_v32 = vpop.permute.xlu1 %529 }
 0x69c   :  { %v555_v33 = vadd.f32 %v1628_v29, %v553_v31  ;;  %v532_v34 = vmul.f32 %v1724_v30, %v530_v32 }
 0x69e   :  { %v1629_v35 = vmul.f32 -1.442695, %v555_v33  ;;  %534 = vrot.lane.b32.xlu0 %v532_v34, %s1834_s13 }
 0x69f   :  { %v574_v39 = vpop.permute.xlu1 %573 }
 0x6a0   :  { %1725 = vpow2.f32 %v1629_v35 }
 0x6ac   :  { %v619_v45 = vpop.permute.xlu1 %618 }
 0x6ad   :  { %v1726_v36 = vpop.eup %1725  ;;  %v621_v46 = vmul.f32 %v619_v45, %v2119_v59 }
 0x6ae   :  { %v559_v37 = vadd.f32 1.0, %v1726_v36 }
 0x6b0   :  { %1727 = vrcp.f32 %v559_v37  ;;  %v598_v50 = vpop.permute.xlu1 %597  ;;  %v1641_v37 = vld [vmem:[%s2523_s2 + $0xc] sm:$0xf] }
 0x6b4   :  { %v546_v51 = vpop.permute.xlu1 %545 }
 0x6b5   :  { %v548_v57 = vmul.f32 %v1724_v30, %v546_v51 }
 0x6b8   :  { %v564_v52 = vpop.permute.xlu1 %563 }
 0x6b9   :  { %v566_v53 = vadd.f32 %v1628_v29, %v564_v52 }
 0x6bb   :  { %v1630_v54 = vmul.f32 -1.442695, %v566_v53 }
 0x6bc   :  { %v631_v30 = vpop.permute.xlu1 %630 }
 0x6bd   :  { %v1728_v38 = vpop.eup %1727  ;;  %v633_v31 = vmul.f32 %v631_v30, %v2119_v59 }
 0x6be   :  { %v576_v40 = vmul.f32 %v1728_v38, %v574_v39  ;;  %v810_v39 = vsub.f32 1.0, %v1641_v37 }
 0x6c0   :  { %578 = vrot.lane.b32.xlu0 %v576_v40, %s1834_s13 }
 0x710   :  { %v535_v41 = vpop.permute.xlu0 %534 }
 0x711   :  { %v537_v43 = vadd.f32 %v1626_v21, %v535_v41  ;;  %v1636_v41 = vld [vmem:[%s2524_s0 + $0xc] sm:$0xf] }
 0x713   :  { %1729 = vtanh.f32 %v537_v43 }
 0x720   :  { %v1730_v44 = vpop.eup %1729 }
 0x721   :  { %541 = vrot.lane.b32.xlu0 %v1730_v44, %s1835_s5 }
 0x725   :  { %623 = vrot.lane.b32.xlu0 %v621_v46, %s1836_s16 }
 0x729   :  { %609 = vperm.xlu0 %1687, %v1632_v19  }
 0x732   :  { %v579_v47 = vpop.permute.xlu0 %578 }
 0x733   :  { %v581_v48 = vadd.f32 %v1628_v29, %v579_v47  ;;  %v1638_v47 = vld [vmem:[%s2525_s1 + $0x10] sm:$0xf] }
 0x735   :  { %1731 = vtanh.f32 %v581_v48 }
 0x736   :  { %1733 = vpow2.f32 %v1630_v54 }
 0x742   :  { %v1732_v49 = vpop.eup %1731 }
 0x743   :  { %585 = vrot.lane.b32.xlu0 %v1732_v49, %s1835_s5  ;;  %v1734_v63 = vpop.eup %1733 }
 0x744   :  { %v570_v18 = vadd.f32 1.0, %v1734_v63 }
 0x746   :  { %1735 = vrcp.f32 %v570_v18 }
 0x753   :  { %v1736_v19 = vpop.eup %1735 }
 0x754   :  { %v583_v21 = vsub.f32 1.0, %v1736_v19  ;;  %v589_v25 = vmul.f32 %v1736_v19, %v2119_v59 }
 0x793   :  { %v542_v56 = vpop.permute.xlu0 %541 }
 0x794   :  { %v544_v58 = vmul.f32 %v542_v56, %v539_v55 }
 0x796   :  { %v549_v42 = vadd.f32 %v548_v57, %v544_v58 }
 0x797   :  { %v624_v61 = vpop.permute.xlu0 %623 }
 0x798   :  { %v2166_v60 = vmul.f32 %v598_v50, %v549_v42 }
 0x79a   :  { %v626_v62 = vadd.f32 %v624_v61, %v2166_v60 }
 0x79c   :  { %636 = vrot.lane.b32.xlu1 %v626_v62, %s1835_s5 }
 0x7a4   :  { %v610_v20 = vpop.permute.xlu0 %609 }
 0x7b5   :  { %v586_v22 = vpop.permute.xlu0 %585 }
 0x7b6   :  { %v588_v27 = vmul.f32 %v586_v22, %v583_v21 }
 0x7b8   :  { %v590_v28 = vadd.f32 %v589_v25, %v588_v27 }
 0x7ba   :  { %v612_v29 = vmul.f32 %v610_v20, %v590_v28 }
 0x7bc   :  { %1634 = vst.msk [vmem:[%s2526_s6 + $0x14] sm:$0xf] %vm222_vm1, %v612_v29  ;;  %v634_v32 = vadd.f32 %v633_v31, %v612_v29 }
 0x80e   :  { %v637_v33 = vpop.permute.xlu1 %636 }
 0x80f   :  { %v2177_v34 = vsel %vm248_vm2, %v637_v33, %v634_v32 }
 0x810   :  { %1635 = vmatmul.mubr.msk.f32.vlgmr.msra.gmra.mxu1 %vm54_vm0, %v2177_v34 }
 0x811   :  { %1046 = vmatpush1.msra.mxu1 %v1885_v1  ;;  %1093 = vmatprep.mubr.f32.mxu1 %v1832_v3 }
 0x812   :  { %1047 = vmatprep.subr.mxu1 %v1890_v2 }
 0x813   :  { %1048 = vmatpush1.msra.mxu1 %v1898_v4 }
 0x814   :  { %1049 = vmatprep.subr.mxu1 %v1905_v5 }
 0x815   :  { %1050 = vmatpush1.msra.mxu1 %v1912_v6 }
 0x816   :  { %1051 = vmatprep.subr.mxu1 %v1919_v7 }
 0x817   :  { %1052 = vmatpush1.msra.mxu1 %v1926_v8 }
 0x818   :  { %1053 = vmatprep.subr.mxu1 %v1933_v9 }
 0x819   :  { %1054 = vmatpush1.msra.mxu1 %v1940_v10 }
 0x81a   :  { %1055 = vmatprep.subr.mxu1 %v1947_v11 }
 0x81b   :  { %1056 = vmatpush1.msra.mxu1 %v1954_v12 }
 0x81c   :  { %1057 = vmatprep.subr.mxu1 %v1961_v13 }
 0x81d   :  { %1058 = vmatpush1.msra.mxu1 %v1968_v14 }
 0x81e   :  { %1059 = vmatprep.subr.mxu1 %v1975_v15 }
 0x81f   :  { %1060 = vmatpush1.msra.mxu1 %v1982_v16 }
 0x820   :  { %1427 = vmatprep.subr.mxu1 %v1880_v0  ;;  %v1642_v0 = vld [vmem:[%s2523_s2 + $0x10] sm:$0xf] }
 0x821   :  { %v822_v40 = vsub.f32 1.0, %v1642_v0 }
 0x8d0   :  { %v709_v59 = vpop.f32.mrf.mxu1 }
 0x8d1   :  { %v710_v35 = vadd.f32 %v709_v59, %v2020_v23 }
 0x8d2   :  { %v711_v36 = vpop.f32.mrf.mxu1 }
 0x8d3   :  { %747 = vrot.lane.b32.xlu1 %v710_v35, %s1836_s16  ;;  %724 = vrot.lane.b32.xlu0 %v710_v35, %s1834_s13  ;;  %v712_v38 = vadd.f32 %v711_v36, %v2022_v24  ;;  %v716_v43 = vadd.f32 %v1636_v41, %v710_v35 }
 0x8d5   :  { %v1637_v44 = vmul.f32 -1.442695, %v716_v43 }
 0x8d7   :  { %768 = vrot.lane.b32.xlu0 %v712_v38, %s1835_s5  ;;  %1737 = vpow2.f32 %v1637_v44 }
 0x8db   :  { %813 = vperm.xlu0 %1687, %v810_v39  }
 0x8df   :  { %792 = vperm.xlu0 %1687, %v1641_v37  }
 0x8e3   :  { %740 = vrot.lane.b32.xlu0 %v2177_v34, %s1836_s16 }
 0x8e4   :  { %v1738_v45 = vpop.eup %1737 }
 0x8e5   :  { %v720_v46 = vadd.f32 1.0, %v1738_v45 }
 0x8e7   :  { %758 = vrot.lane.b32.xlu0 %v712_v38, %s1836_s16  ;;  %1739 = vrcp.f32 %v720_v46 }
 0x8eb   :  { %825 = vperm.xlu0 %1687, %v822_v40  }
 0x8f4   :  { %v1740_v48 = vpop.eup %1739 }
 0x8f5   :  { %v734_v30 = vsub.f32 1.0, %v1740_v48 }
 0x945   :  { %v748_v49 = vpop.permute.xlu1 %747  ;;  %v725_v50 = vpop.permute.xlu0 %724 }
 0x946   :  { %v750_v51 = vadd.f32 %v1638_v47, %v748_v49  ;;  %v727_v52 = vmul.f32 %v1740_v48, %v725_v50 }
 0x948   :  { %v1639_v53 = vmul.f32 -1.442695, %v750_v51  ;;  %729 = vrot.lane.b32.xlu1 %v727_v52, %s1834_s13 }
 0x949   :  { %v769_v57 = vpop.permute.xlu0 %768 }
 0x94a   :  { %1741 = vpow2.f32 %v1639_v53 }
 0x956   :  { %v814_v63 = vpop.permute.xlu0 %813 }
 0x957   :  { %v1742_v54 = vpop.eup %1741  ;;  %v816_v18 = vmul.f32 %v814_v63, %v2177_v34 }
 0x958   :  { %v754_v55 = vadd.f32 1.0, %v1742_v54 }
 0x95a   :  { %1743 = vrcp.f32 %v754_v55  ;;  %v793_v22 = vpop.permute.xlu0 %792 }
 0x95e   :  { %v741_v25 = vpop.permute.xlu0 %740 }
 0x95f   :  { %v743_v32 = vmul.f32 %v1740_v48, %v741_v25 }
 0x962   :  { %v759_v27 = vpop.permute.xlu0 %758 }
 0x963   :  { %v761_v28 = vadd.f32 %v1638_v47, %v759_v27 }
 0x965   :  { %v1640_v29 = vmul.f32 -1.442695, %v761_v28 }
 0x966   :  { %v826_v48 = vpop.permute.xlu0 %825 }
 0x967   :  { %v1744_v56 = vpop.eup %1743  ;;  %v828_v49 = vmul.f32 %v826_v48, %v2177_v34 }
 0x968   :  { %v771_v58 = vmul.f32 %v1744_v56, %v769_v57 }
 0x96a   :  { %773 = vrot.lane.b32.xlu1 %v771_v58, %s1834_s13 }
 0x9ba   :  { %v730_v42 = vpop.permute.xlu1 %729 }
 0x9bb   :  { %v732_v61 = vadd.f32 %v1636_v41, %v730_v42 }
 0x9bd   :  { %1745 = vtanh.f32 %v732_v61 }
 0x9ca   :  { %v1746_v62 = vpop.eup %1745 }
 0x9cb   :  { %736 = vrot.lane.b32.xlu1 %v1746_v62, %s1835_s5 }
 0x9cf   :  { %818 = vrot.lane.b32.xlu1 %v816_v18, %s1836_s16 }
 0x9d3   :  { %804 = vperm.xlu1 %1688, %v1642_v0  }
 0x9dc   :  { %v774_v19 = vpop.permute.xlu1 %773 }
 0x9dd   :  { %v776_v20 = vadd.f32 %v1638_v47, %v774_v19 }
 0x9df   :  { %1747 = vtanh.f32 %v776_v20 }
 0x9e0   :  { %1749 = vpow2.f32 %v1640_v29 }
 0x9ec   :  { %v1748_v21 = vpop.eup %1747 }
 0x9ed   :  { %780 = vrot.lane.b32.xlu1 %v1748_v21, %s1835_s5  ;;  %v1750_v38 = vpop.eup %1749 }
 0x9ee   :  { %v765_v39 = vadd.f32 1.0, %v1750_v38 }
 0x9f0   :  { %1751 = vrcp.f32 %v765_v39 }
 0x9fd   :  { %v1752_v0 = vpop.eup %1751 }
 0x9fe   :  { %v778_v41 = vsub.f32 1.0, %v1752_v0  ;;  %v784_v44 = vmul.f32 %v1752_v0, %v2177_v34 }
 0xa3d   :  { %v737_v31 = vpop.permute.xlu1 %736 }
 0xa3e   :  { %v739_v33 = vmul.f32 %v737_v31, %v734_v30 }
 0xa40   :  { %v744_v59 = vadd.f32 %v743_v32, %v739_v33 }
 0xa41   :  { %v819_v36 = vpop.permute.xlu1 %818 }
 0xa42   :  { %v2224_v35 = vmul.f32 %v793_v22, %v744_v59 }
 0xa44   :  { %v821_v37 = vadd.f32 %v819_v36, %v2224_v35 }
 0xa46   :  { %831 = vrot.lane.b32.xlu0 %v821_v37, %s1835_s5 }
 0xa4e   :  { %v805_v40 = vpop.permute.xlu1 %804 }
 0xa5f   :  { %v781_v43 = vpop.permute.xlu1 %780 }
 0xa60   :  { %v783_v45 = vmul.f32 %v781_v43, %v778_v41 }
 0xa62   :  { %v785_v46 = vadd.f32 %v784_v44, %v783_v45 }
 0xa64   :  { %v807_v47 = vmul.f32 %v805_v40, %v785_v46 }
 0xa66   :  { %1644 = vst.msk [vmem:[%s2526_s6 + $0x10] sm:$0xf] %vm222_vm1, %v807_v47  ;;  %v829_v50 = vadd.f32 %v828_v49, %v807_v47 }
 0xab8   :  { %v832_v51 = vpop.permute.xlu0 %831 }
 0xab9   :  { %v2235_v52 = vsel %vm248_vm2, %v832_v51, %v829_v50 }
 0xaba   :  { %1645 = vmatmul.mubr.msk.f32.vlgmr.msra.gmra.mxu0 %vm54_vm0, %v2235_v52 }
 0xabb   :  { %1237 = vmatpush1.msra.mxu0 %v1885_v1  ;;  %1284 = vmatprep.mubr.f32.mxu0 %v1832_v3 }
 0xabc   :  { %1238 = vmatprep.subr.mxu0 %v1890_v2 }
 0xabd   :  { %1239 = vmatpush1.msra.mxu0 %v1898_v4 }
 0xabe   :  { %1240 = vmatprep.subr.mxu0 %v1905_v5  ;;  %v1651_v5 = vld [vmem:[%s2523_s2 + $0x10] sm:$0xf] }
 0xabf   :  { %1241 = vmatpush1.msra.mxu0 %v1912_v6 }
 0xac0   :  { %1242 = vmatprep.subr.mxu0 %v1919_v7  ;;  %v1001_v7 = vsub.f32 1.0, %v1651_v5 }
 0xac1   :  { %1243 = vmatpush1.msra.mxu0 %v1926_v8  ;;  %v1652_v8 = vld [vmem:[%s2523_s2 + $0xc] sm:$0xf] }
 0xac2   :  { %1244 = vmatprep.subr.mxu0 %v1933_v9  ;;  %v1013_v9 = vsub.f32 1.0, %v1652_v8 }
 0xac3   :  { %1245 = vmatpush1.msra.mxu0 %v1940_v10  ;;  %v1646_v10 = vld [vmem:[%s2524_s0 + $0x10] sm:$0xf] }
 0xac4   :  { %1246 = vmatprep.subr.mxu0 %v1947_v11 }
 0xac5   :  { %1247 = vmatpush1.msra.mxu0 %v1954_v12 }
 0xac6   :  { %1248 = vmatprep.subr.mxu0 %v1961_v13 }
 0xac7   :  { %1249 = vmatpush1.msra.mxu0 %v1968_v14 }
 0xac8   :  { %1250 = vmatprep.subr.mxu0 %v1975_v15  ;;  %v1648_v15 = vld [vmem:[%s2525_s1 + $0xc] sm:$0xf] }
 0xac9   :  { %1251 = vmatpush1.msra.mxu0 %v1982_v16 }
 0xb7a   :  { %v904_v1 = vpop.f32.mrf.mxu0 }
 0xb7b   :  { %v905_v2 = vadd.f32 %v904_v1, %v2020_v23 }
 0xb7c   :  { %v906_v4 = vpop.f32.mrf.mxu0 }
 0xb7d   :  { %942 = vrot.lane.b32.xlu0 %v905_v2, %s1836_s16  ;;  %919 = vrot.lane.b32.xlu1 %v905_v2, %s1834_s13  ;;  %v907_v6 = vadd.f32 %v906_v4, %v2022_v24  ;;  %v911_v11 = vadd.f32 %v1646_v10, %v905_v2 }
 0xb7f   :  { %v1647_v12 = vmul.f32 -1.442695, %v911_v11  ;;  %v1823_v11 = vld [vmem:[%s2520_s4 + $0x40] sm:$0xff] }
 0xb81   :  { %963 = vrot.lane.b32.xlu1 %v907_v6, %s1835_s5  ;;  %1753 = vpow2.f32 %v1647_v12  ;;  %v1824_v12 = vld [vmem:[%s2520_s4 + $0x38] sm:$0xff] }
 0xb85   :  { %1004 = vperm.xlu1 %1688, %v1001_v7   ;;  %v1817_v7 = vld [vmem:[%s2520_s4 + $0x70] sm:$0xff] }
 0xb89   :  { %985 = vperm.xlu1 %1688, %v1651_v5  }
 0xb8d   :  { %935 = vrot.lane.b32.xlu1 %v2235_v52, %s1836_s16 }
 0xb8e   :  { %v1754_v13 = vpop.eup %1753 }
 0xb8f   :  { %v915_v14 = vadd.f32 1.0, %v1754_v13  ;;  %v1825_v13 = vld [vmem:[%s2520_s4 + $0x30] sm:$0xff] }
 0xb91   :  { %953 = vrot.lane.b32.xlu1 %v907_v6, %s1836_s16  ;;  %1755 = vrcp.f32 %v915_v14  ;;  %v1826_v14 = vld [vmem:[%s2520_s4 + $0x28] sm:$0xff] }
 0xb95   :  { %1016 = vperm.xlu1 %1688, %v1013_v9   ;;  %v1820_v9 = vld [vmem:[%s2520_s4 + $0x58] sm:$0xff] }
 0xb9e   :  { %v1756_v16 = vpop.eup %1755 }
 0xb9f   :  { %v929_v30 = vsub.f32 1.0, %v1756_v16 }
 0xbef   :  { %v943_v34 = vpop.permute.xlu0 %942  ;;  %v920_v53 = vpop.permute.xlu1 %919 }
 0xbf0   :  { %v945_v54 = vadd.f32 %v1648_v15, %v943_v34  ;;  %v922_v55 = vmul.f32 %v1756_v16, %v920_v53  ;;  %v1829_v34 = vld [vmem:[%s2520_s4 + $0x10] sm:$0xff]  ;;  %v1830_v53 = vld [vmem:[%s2520_s4 + $0x8] sm:$0xff] }
 0xbf2   :  { %v1649_v56 = vmul.f32 -1.442695, %v945_v54  ;;  %924 = vrot.lane.b32.xlu0 %v922_v55, %s1834_s13  ;;  %v1831_v54 = vld [vmem:[%s2520_s4] sm:$0xff] }
 0xbf3   :  { %v964_v61 = vpop.permute.xlu1 %963 }
 0xbf4   :  { %1757 = vpow2.f32 %v1649_v56 }
 0xc00   :  { %v1005_v20 = vpop.permute.xlu1 %1004 }
 0xc01   :  { %v1758_v57 = vpop.eup %1757  ;;  %v1007_v21 = vmul.f32 %v1005_v20, %v2235_v52 }
 0xc02   :  { %v949_v58 = vadd.f32 1.0, %v1758_v57 }
 0xc04   :  { %1759 = vrcp.f32 %v949_v58  ;;  %v986_v28 = vpop.permute.xlu1 %985  ;;  %v1661_v58 = vld [vmem:[%s2523_s2 + $0x14] sm:$0xf] }
 0xc08   :  { %v936_v29 = vpop.permute.xlu1 %935 }
 0xc09   :  { %v938_v32 = vmul.f32 %v1756_v16, %v936_v29  ;;  %v1828_v16 = vld [vmem:[%s2520_s4 + $0x18] sm:$0xff] }
 0xc0c   :  { %v954_v39 = vpop.permute.xlu1 %953 }
 0xc0d   :  { %v956_v0 = vadd.f32 %v1648_v15, %v954_v39 }
 0xc0f   :  { %v1650_v40 = vmul.f32 -1.442695, %v956_v0 }
 0xc10   :  { %v1017_v51 = vpop.permute.xlu1 %1016 }
 0xc11   :  { %v1760_v42 = vpop.eup %1759  ;;  %v1019_v2 = vmul.f32 %v1017_v51, %v2235_v52 }
 0xc12   :  { %v966_v62 = vmul.f32 %v1760_v42, %v964_v61  ;;  %v1192_v61 = vsub.f32 1.0, %v1661_v58 }
 0xc14   :  { %968 = vrot.lane.b32.xlu0 %v966_v62, %s1834_s13  ;;  %v1662_v62 = vld [vmem:[%s2523_s2 + $0x8] sm:$0xf] }
 0xc64   :  { %v925_v63 = vpop.permute.xlu0 %924 }
 0xc65   :  { %v927_v18 = vadd.f32 %v1646_v10, %v925_v63  ;;  %v1821_v10 = vld [vmem:[%s2520_s4 + $0x50] sm:$0xff]  ;;  %v1204_v63 = vsub.f32 1.0, %v1662_v62 }
 0xc67   :  { %1761 = vtanh.f32 %v927_v18  ;;  %v1656_v18 = vld [vmem:[%s2524_s0 + $0x14] sm:$0xf] }
 0xc74   :  { %v1762_v19 = vpop.eup %1761 }
 0xc75   :  { %931 = vrot.lane.b32.xlu0 %v1762_v19, %s1835_s5 }
 0xc79   :  { %1009 = vrot.lane.b32.xlu0 %v1007_v21, %s1836_s16 }
 0xc7d   :  { %996 = vperm.xlu0 %1687, %v1652_v8   ;;  %v1819_v8 = vld [vmem:[%s2520_s4 + $0x60] sm:$0xff] }
 0xc86   :  { %v969_v22 = vpop.permute.xlu0 %968 }
 0xc87   :  { %v971_v25 = vadd.f32 %v1648_v15, %v969_v22  ;;  %v1827_v15 = vld [vmem:[%s2520_s4 + $0x20] sm:$0xff] }
 0xc89   :  { %1763 = vtanh.f32 %v971_v25  ;;  %v1658_v25 = vld [vmem:[%s2525_s1 + $0x8] sm:$0xf] }
 0xc8a   :  { %1765 = vpow2.f32 %v1650_v40 }
 0xc96   :  { %v1764_v27 = vpop.eup %1763 }
 0xc97   :  { %975 = vrot.lane.b32.xlu0 %v1764_v27, %s1835_s5  ;;  %v1766_v41 = vpop.eup %1765 }
 0xc98   :  { %v960_v43 = vadd.f32 1.0, %v1766_v41 }
 0xc9a   :  { %1767 = vrcp.f32 %v960_v43 }
 0xca7   :  { %v1768_v45 = vpop.eup %1767 }
 0xca8   :  { %v973_v47 = vsub.f32 1.0, %v1768_v45  ;;  %v979_v49 = vmul.f32 %v1768_v45, %v2235_v52  ;;  %v1818_v52 = vld [vmem:[%s2520_s4 + $0x68] sm:$0xff] }
 0xce7   :  { %v932_v31 = vpop.permute.xlu0 %931 }
 0xce8   :  { %v934_v33 = vmul.f32 %v932_v31, %v929_v30 }
 0xcea   :  { %v939_v59 = vadd.f32 %v938_v32, %v934_v33 }
 0xceb   :  { %v1010_v37 = vpop.permute.xlu0 %1009 }
 0xcec   :  { %v2281_v36 = vmul.f32 %v986_v28, %v939_v59 }
 0xcee   :  { %v1012_v38 = vadd.f32 %v1010_v37, %v2281_v36 }
 0xcf0   :  { %1022 = vrot.lane.b32.xlu1 %v1012_v38, %s1835_s5 }
 0xcf8   :  { %v997_v44 = vpop.permute.xlu0 %996 }
 0xd09   :  { %v976_v46 = vpop.permute.xlu0 %975 }
 0xd0a   :  { %v978_v48 = vmul.f32 %v976_v46, %v973_v47 }
 0xd0c   :  { %v980_v50 = vadd.f32 %v979_v49, %v978_v48 }
 0xd0e   :  { %v2286_v1 = vmul.f32 %v997_v44, %v980_v50 }
 0xd10   :  { %v1020_v4 = vadd.f32 %v1019_v2, %v2286_v1 }
 0xd62   :  { %v1023_v5 = vpop.permute.xlu1 %1022 }
 0xd63   :  { %v2291_v6 = vsel %vm248_vm2, %v1023_v5, %v1020_v4 }
 0xd64   :  { %1655 = vmatmul.mubr.msk.f32.vlgmr.msra.gmra.mxu1 %vm54_vm0, %v2291_v6 }
 0xd65   :  { %1428 = vmatpush1.msra.mxu1 %v1817_v7  ;;  %1475 = vmatprep.mubr.f32.mxu1 %v1832_v3  ;;  %v1822_v3 = vld [vmem:[%s2520_s4 + $0x48] sm:$0xff] }
 0xd66   :  { %1429 = vmatprep.subr.mxu1 %v1818_v52 }
 0xd67   :  { %1430 = vmatpush1.msra.mxu1 %v1819_v8 }
 0xd68   :  { %1431 = vmatprep.subr.mxu1 %v1820_v9 }
 0xd69   :  { %1432 = vmatpush1.msra.mxu1 %v1821_v10 }
 0xd6a   :  { %1433 = vmatprep.subr.mxu1 %v1822_v3 }
 0xd6b   :  { %1434 = vmatpush1.msra.mxu1 %v1823_v11 }
 0xd6c   :  { %1435 = vmatprep.subr.mxu1 %v1824_v12 }
 0xd6d   :  { %1436 = vmatpush1.msra.mxu1 %v1825_v13 }
 0xd6e   :  { %1437 = vmatprep.subr.mxu1 %v1826_v14 }
 0xd6f   :  { %1438 = vmatpush1.msra.mxu1 %v1827_v15 }
 0xd70   :  { %1439 = vmatprep.subr.mxu1 %v1828_v16 }
 0xd71   :  { %1440 = vmatpush1.msra.mxu1 %v1829_v34 }
 0xd72   :  { %1441 = vmatprep.subr.mxu1 %v1830_v53 }
 0xd73   :  { %1442 = vmatpush1.msra.mxu1 %v1831_v54 }
 0xe24   :  { %v1095_v55 = vpop.f32.mrf.mxu1 }
 0xe25   :  { %v1096_v56 = vadd.f32 %v1095_v55, %v2020_v23 }
 0xe26   :  { %v1097_v57 = vpop.f32.mrf.mxu1 }
 0xe27   :  { %1133 = vrot.lane.b32.xlu1 %v1096_v56, %s1836_s16  ;;  %1110 = vrot.lane.b32.xlu0 %v1096_v56, %s1834_s13  ;;  %v1098_v42 = vadd.f32 %v1097_v57, %v2022_v24  ;;  %v1102_v19 = vadd.f32 %v1656_v18, %v1096_v56 }
 0xe29   :  { %v1657_v20 = vmul.f32 -1.442695, %v1102_v19 }
 0xe2b   :  { %1154 = vrot.lane.b32.xlu0 %v1098_v42, %s1835_s5  ;;  %1769 = vpow2.f32 %v1657_v20 }
 0xe2f   :  { %1195 = vperm.xlu0 %1687, %v1192_v61  }
 0xe33   :  { %1176 = vperm.xlu0 %1687, %v1661_v58  }
 0xe37   :  { %1126 = vrot.lane.b32.xlu0 %v2291_v6, %s1836_s16 }
 0xe38   :  { %v1770_v21 = vpop.eup %1769 }
 0xe39   :  { %v1106_v22 = vadd.f32 1.0, %v1770_v21  ;;  %v1672_v21 = vld [vmem:[%s2523_s2 + $0x4] sm:$0xf] }
 0xe3b   :  { %1144 = vrot.lane.b32.xlu0 %v1098_v42, %s1836_s16  ;;  %1771 = vrcp.f32 %v1106_v22  ;;  %v1395_v22 = vsub.f32 1.0, %v1672_v21 }
 0xe3f   :  { %1207 = vperm.xlu0 %1687, %v1204_v63  }
 0xe48   :  { %v1772_v27 = vpop.eup %1771 }
 0xe49   :  { %v1120_v50 = vsub.f32 1.0, %v1772_v27 }
 0xe99   :  { %v1134_v28 = vpop.permute.xlu1 %1133  ;;  %v1111_v29 = vpop.permute.xlu0 %1110 }
 0xe9a   :  { %v1136_v30 = vadd.f32 %v1658_v25, %v1134_v28  ;;  %v1113_v31 = vmul.f32 %v1772_v27, %v1111_v29 }
 0xe9c   :  { %v1659_v32 = vmul.f32 -1.442695, %v1136_v30  ;;  %1115 = vrot.lane.b32.xlu1 %v1113_v31, %s1834_s13  ;;  %v1668_v31 = vld [vmem:[%s2525_s1 + $0x4] sm:$0xf] }
 0xe9d   :  { %v1155_v38 = vpop.permute.xlu0 %1154 }
 0xe9e   :  { %1773 = vpow2.f32 %v1659_v32 }
 0xeaa   :  { %v1196_v43 = vpop.permute.xlu0 %1195 }
 0xeab   :  { %v1774_v33 = vpop.eup %1773  ;;  %v1198_v44 = vmul.f32 %v1196_v43, %v2291_v6 }
 0xeac   :  { %v1140_v59 = vadd.f32 1.0, %v1774_v33 }
 0xeae   :  { %1775 = vrcp.f32 %v1140_v59  ;;  %v1177_v48 = vpop.permute.xlu0 %1176 }
 0xeb2   :  { %v1127_v49 = vpop.permute.xlu0 %1126 }
 0xeb3   :  { %v1129_v2 = vmul.f32 %v1772_v27, %v1127_v49 }
 0xeb6   :  { %v1145_v9 = vpop.permute.xlu0 %1144 }
 0xeb7   :  { %v1147_v10 = vadd.f32 %v1658_v25, %v1145_v9 }
 0xeb9   :  { %v1660_v3 = vmul.f32 -1.442695, %v1147_v10 }
 0xeba   :  { %v1208_v55 = vpop.permute.xlu0 %1207 }
 0xebb   :  { %v1776_v37 = vpop.eup %1775  ;;  %v1210_v57 = vmul.f32 %v1208_v55, %v2291_v6 }
 0xebc   :  { %v1157_v39 = vmul.f32 %v1776_v37, %v1155_v38 }
 0xebe   :  { %1159 = vrot.lane.b32.xlu1 %v1157_v39, %s1834_s13 }
 0xf0e   :  { %v1116_v0 = vpop.permute.xlu1 %1115 }
 0xf0f   :  { %v1118_v40 = vadd.f32 %v1656_v18, %v1116_v0 }
 0xf11   :  { %1777 = vtanh.f32 %v1118_v40 }
 0xf1e   :  { %v1778_v41 = vpop.eup %1777 }
 0xf1f   :  { %1122 = vrot.lane.b32.xlu1 %v1778_v41, %s1835_s5 }
 0xf23   :  { %1200 = vrot.lane.b32.xlu1 %v1198_v44, %s1836_s16 }
 0xf27   :  { %1187 = vperm.xlu1 %1688, %v1662_v62  }
 0xf30   :  { %v1160_v45 = vpop.permute.xlu1 %1159 }
 0xf31   :  { %v1162_v46 = vadd.f32 %v1658_v25, %v1160_v45  ;;  %v1666_v25 = vld [vmem:[%s2524_s0 + $0x18] sm:$0xf] }
 0xf33   :  { %1779 = vtanh.f32 %v1162_v46 }
 0xf34   :  { %1781 = vpow2.f32 %v1660_v3 }
 0xf40   :  { %v1780_v47 = vpop.eup %1779 }
 0xf41   :  { %1166 = vrot.lane.b32.xlu1 %v1780_v47, %s1835_s5  ;;  %v1782_v11 = vpop.eup %1781 }
 0xf42   :  { %v1151_v12 = vadd.f32 1.0, %v1782_v11 }
 0xf44   :  { %1783 = vrcp.f32 %v1151_v12 }
 0xf51   :  { %v1784_v14 = vpop.eup %1783 }
 0xf52   :  { %v1164_v16 = vsub.f32 1.0, %v1784_v14  ;;  %v1170_v53 = vmul.f32 %v1784_v14, %v2291_v6  ;;  %v1671_v6 = vld [vmem:[%s2523_s2 + $0x18] sm:$0xf] }
 0xf53   :  { %v1383_v20 = vsub.f32 1.0, %v1671_v6 }
 0xf91   :  { %v1123_v51 = vpop.permute.xlu1 %1122 }
 0xf92   :  { %v1125_v4 = vmul.f32 %v1123_v51, %v1120_v50 }
 0xf94   :  { %v1130_v5 = vadd.f32 %v1129_v2, %v1125_v4 }
 0xf95   :  { %v1201_v52 = vpop.permute.xlu1 %1200 }
 0xf96   :  { %v2367_v7 = vmul.f32 %v1177_v48, %v1130_v5 }
 0xf98   :  { %v1203_v8 = vadd.f32 %v1201_v52, %v2367_v7 }
 0xf9a   :  { %1213 = vrot.lane.b32.xlu0 %v1203_v8, %s1835_s5 }
 0xfa2   :  { %v1188_v13 = vpop.permute.xlu1 %1187 }
 0xfb3   :  { %v1167_v15 = vpop.permute.xlu1 %1166 }
 0xfb4   :  { %v1169_v34 = vmul.f32 %v1167_v15, %v1164_v16 }
 0xfb6   :  { %v1171_v54 = vadd.f32 %v1170_v53, %v1169_v34 }
 0xfb8   :  { %v2372_v56 = vmul.f32 %v1188_v13, %v1171_v54 }
 0xfba   :  { %v1211_v58 = vadd.f32 %v1210_v57, %v2372_v56 }
0x100c   :  { %v1214_v42 = vpop.permute.xlu0 %1213 }
0x100d   :  { %v2377_v61 = vsel %vm248_vm2, %v1214_v42, %v1211_v58 }
0x100e   :  { %1665 = vmatmul.mubr.msk.f32.vlgmr.msra.gmra.mxu0 %vm54_vm0, %v2377_v61 }
0x10ce   :  { %v1286_v62 = vpop.f32.mrf.mxu0 }
0x10cf   :  { %v1287_v63 = vadd.f32 %v1286_v62, %v2020_v23 }
0x10d0   :  { %v1288_v18 = vpop.f32.mrf.mxu0 }
0x10d1   :  { %1324 = vrot.lane.b32.xlu0 %v1287_v63, %s1836_s16  ;;  %1301 = vrot.lane.b32.xlu1 %v1287_v63, %s1834_s13  ;;  %v1289_v19 = vadd.f32 %v1288_v18, %v2022_v24  ;;  %v1293_v27 = vadd.f32 %v1666_v25, %v1287_v63 }
0x10d3   :  { %v1667_v28 = vmul.f32 -1.442695, %v1293_v27 }
0x10d5   :  { %1345 = vrot.lane.b32.xlu1 %v1289_v19, %s1835_s5  ;;  %1785 = vpow2.f32 %v1667_v28 }
0x10d9   :  { %1386 = vperm.xlu1 %1688, %v1383_v20  }
0x10dd   :  { %1367 = vperm.xlu1 %1688, %v1671_v6  }
0x10e1   :  { %1317 = vrot.lane.b32.xlu1 %v2377_v61, %s1836_s16 }
0x10e2   :  { %v1786_v29 = vpop.eup %1785 }
0x10e3   :  { %v1297_v30 = vadd.f32 1.0, %v1786_v29 }
0x10e5   :  { %1335 = vrot.lane.b32.xlu1 %v1289_v19, %s1836_s16  ;;  %1787 = vrcp.f32 %v1297_v30 }
0x10e9   :  { %1398 = vperm.xlu1 %1688, %v1395_v22  }
0x10f2   :  { %v1788_v32 = vpop.eup %1787 }
0x10f3   :  { %v1311_v52 = vsub.f32 1.0, %v1788_v32 }
0x1143   :  { %v1325_v33 = vpop.permute.xlu0 %1324  ;;  %v1302_v59 = vpop.permute.xlu1 %1301 }
0x1144   :  { %v1327_v37 = vadd.f32 %v1668_v31, %v1325_v33  ;;  %v1304_v38 = vmul.f32 %v1788_v32, %v1302_v59 }
0x1146   :  { %v1669_v39 = vmul.f32 -1.442695, %v1327_v37  ;;  %1306 = vrot.lane.b32.xlu0 %v1304_v38, %s1834_s13 }
0x1147   :  { %v1346_v43 = vpop.permute.xlu1 %1345 }
0x1148   :  { %1789 = vpow2.f32 %v1669_v39 }
0x1154   :  { %v1387_v48 = vpop.permute.xlu1 %1386 }
0x1155   :  { %v1790_v0 = vpop.eup %1789  ;;  %v1389_v49 = vmul.f32 %v1387_v48, %v2377_v61 }
0x1156   :  { %v1331_v40 = vadd.f32 1.0, %v1790_v0 }
0x1158   :  { %1791 = vrcp.f32 %v1331_v40  ;;  %v1368_v4 = vpop.permute.xlu1 %1367 }
0x115c   :  { %v1318_v5 = vpop.permute.xlu1 %1317 }
0x115d   :  { %v1320_v9 = vmul.f32 %v1788_v32, %v1318_v5 }
0x1160   :  { %v1336_v14 = vpop.permute.xlu1 %1335 }
0x1161   :  { %v1338_v15 = vadd.f32 %v1668_v31, %v1336_v14 }
0x1163   :  { %v1670_v16 = vmul.f32 -1.442695, %v1338_v15 }
0x1164   :  { %v1399_v18 = vpop.permute.xlu1 %1398 }
0x1165   :  { %v1792_v41 = vpop.eup %1791  ;;  %v1401_v19 = vmul.f32 %v1399_v18, %v2377_v61 }
0x1166   :  { %v1348_v44 = vmul.f32 %v1792_v41, %v1346_v43 }
0x1168   :  { %1350 = vrot.lane.b32.xlu0 %v1348_v44, %s1834_s13 }
0x11b8   :  { %v1307_v45 = vpop.permute.xlu0 %1306 }
0x11b9   :  { %v1309_v46 = vadd.f32 %v1666_v25, %v1307_v45 }
0x11bb   :  { %1793 = vtanh.f32 %v1309_v46 }
0x11c8   :  { %v1794_v47 = vpop.eup %1793 }
0x11c9   :  { %1313 = vrot.lane.b32.xlu0 %v1794_v47, %s1835_s5 }
0x11cd   :  { %1391 = vrot.lane.b32.xlu0 %v1389_v49, %s1836_s16 }
0x11d1   :  { %1378 = vperm.xlu0 %1687, %v1672_v21  }
0x11da   :  { %v1351_v50 = vpop.permute.xlu0 %1350 }
0x11db   :  { %v1353_v51 = vadd.f32 %v1668_v31, %v1351_v50 }
0x11dd   :  { %1795 = vtanh.f32 %v1353_v51 }
0x11de   :  { %1797 = vpow2.f32 %v1670_v16 }
0x11ea   :  { %v1796_v2 = vpop.eup %1795 }
0x11eb   :  { %1357 = vrot.lane.b32.xlu0 %v1796_v2, %s1835_s5  ;;  %v1798_v34 = vpop.eup %1797 }
0x11ec   :  { %v1342_v53 = vadd.f32 1.0, %v1798_v34 }
0x11ee   :  { %1799 = vrcp.f32 %v1342_v53 }
0x11fb   :  { %v1800_v55 = vpop.eup %1799 }
0x11fc   :  { %v1355_v58 = vsub.f32 1.0, %v1800_v55  ;;  %v1361_v62 = vmul.f32 %v1800_v55, %v2377_v61  ;;  %v1680_v61 = vld [vmem:[%s2523_s2 + $0x1c] sm:$0xf] }
0x11fd   :  { %v1573_v30 = vsub.f32 1.0, %v1680_v61 }
0x123b   :  { %v1314_v8 = vpop.permute.xlu0 %1313 }
0x123c   :  { %v1316_v10 = vmul.f32 %v1314_v8, %v1311_v52 }
0x123e   :  { %v1321_v3 = vadd.f32 %v1320_v9, %v1316_v10 }
0x123f   :  { %v1392_v12 = vpop.permute.xlu0 %1391 }
0x1240   :  { %v2407_v11 = vmul.f32 %v1368_v4, %v1321_v3 }
0x1242   :  { %v1394_v13 = vadd.f32 %v1392_v12, %v2407_v11 }
0x1244   :  { %1404 = vrot.lane.b32.xlu1 %v1394_v13, %s1835_s5 }
0x124c   :  { %v1379_v54 = vpop.permute.xlu0 %1378 }
0x125d   :  { %v1358_v57 = vpop.permute.xlu0 %1357 }
0x125e   :  { %v1360_v42 = vmul.f32 %v1358_v57, %v1355_v58 }
0x1260   :  { %v1362_v63 = vadd.f32 %v1361_v62, %v1360_v42 }
0x1262   :  { %v2412_v6 = vmul.f32 %v1379_v54, %v1362_v63 }
0x1264   :  { %v1402_v20 = vadd.f32 %v1401_v19, %v2412_v6 }
0x12b6   :  { %v1405_v21 = vpop.permute.xlu1 %1404 }
0x12b7   :  { %v2417_v22 = vsel %vm248_vm2, %v1405_v21, %v1402_v20 }
0x12b8   :  { %1675 = vmatmul.mubr.msk.f32.vlgmr.msra.gmra.mxu1 %vm54_vm0, %v2417_v22 }
0x1378   :  { %v1477_v25 = vpop.f32.mrf.mxu1 }
0x1379   :  { %v1478_v27 = vadd.f32 %v1477_v25, %v2020_v23  ;;  %v1554_v23 = vld [vmem:[%s2523_s2] sm:$0xf] }
0x137a   :  { %v1479_v28 = vpop.f32.mrf.mxu1  ;;  %v1585_v31 = vsub.f32 1.0, %v1554_v23 }
0x137b   :  { %1514 = vrot.lane.b32.xlu1 %v1478_v27, %s1836_s16  ;;  %1492 = vrot.lane.b32.xlu0 %v1478_v27, %s1834_s13  ;;  %v1480_v29 = vadd.f32 %v1479_v28, %v2022_v24  ;;  %v1676_v24 = vld [vmem:[%s2524_s0 + $0x1c] sm:$0xf] }
0x137c   :  { %v1484_v32 = vadd.f32 %v1676_v24, %v1478_v27 }
0x137e   :  { %v1677_v33 = vmul.f32 -1.442695, %v1484_v32 }
0x137f   :  { %1535 = vrot.lane.b32.xlu0 %v1480_v29, %s1835_s5 }
0x1380   :  { %1801 = vpow2.f32 %v1677_v33 }
0x1383   :  { %1576 = vperm.xlu0 %1687, %v1573_v30  }
0x1387   :  { %1557 = vperm.xlu0 %1687, %v1680_v61  }
0x138b   :  { %1508 = vrot.lane.b32.xlu0 %v2417_v22, %s1836_s16 }
0x138d   :  { %v1802_v59 = vpop.eup %1801 }
0x138e   :  { %v1488_v37 = vadd.f32 1.0, %v1802_v59 }
0x138f   :  { %1525 = vrot.lane.b32.xlu0 %v1480_v29, %s1836_s16 }
0x1390   :  { %1803 = vrcp.f32 %v1488_v37 }
0x1393   :  { %1588 = vperm.xlu0 %1687, %v1585_v31  }
0x1397   :  { %210 = vrot.lane.b32.xlu0 %v2050_v26, %s1835_s5  ;;  %v1513_v26 = vld [vmem:[%s2525_s1] sm:$0xf] }
0x139b   :  { %602 = vrot.lane.b32.xlu0 %v2166_v60, %s1835_s5 }
0x139d   :  { %v1804_v38 = vpop.eup %1803 }
0x139e   :  { %v1502_v15 = vsub.f32 1.0, %v1804_v38 }
0x139f   :  { %1181 = vrot.lane.b32.xlu0 %v2367_v7, %s1835_s5 }
0x13ed   :  { %v1515_v39 = vpop.permute.xlu1 %1514  ;;  %v1493_v60 = vpop.permute.xlu0 %1492 }
0x13ee   :  { %v1517_v0 = vadd.f32 %v1515_v39, %v1513_v26  ;;  %v1495_v40 = vmul.f32 %v1804_v38, %v1493_v60 }
0x13f0   :  { %v1678_v7 = vmul.f32 -1.442695, %v1517_v0  ;;  %1497 = vrot.lane.b32.xlu1 %v1495_v40, %s1834_s13 }
0x13f1   :  { %v1536_v41 = vpop.permute.xlu0 %1535 }
0x13f2   :  { %1805 = vpow2.f32 %v1678_v7 }
0x13fe   :  { %v1577_v43 = vpop.permute.xlu0 %1576 }
0x13ff   :  { %v1806_v44 = vpop.eup %1805  ;;  %v1579_v10 = vmul.f32 %v1577_v43, %v2417_v22 }
0x1400   :  { %v1521_v45 = vadd.f32 1.0, %v1806_v44 }
0x1402   :  { %1807 = vrcp.f32 %v1521_v45  ;;  %v1558_v46 = vpop.permute.xlu0 %1557 }
0x1406   :  { %v1509_v47 = vpop.permute.xlu0 %1508 }
0x1407   :  { %v1511_v16 = vmul.f32 %v1804_v38, %v1509_v47 }
0x140a   :  { %v1526_v48 = vpop.permute.xlu0 %1525 }
0x140b   :  { %v1528_v13 = vadd.f32 %v1526_v48, %v1513_v26 }
0x140d   :  { %v1679_v14 = vmul.f32 -1.442695, %v1528_v13 }
0x140e   :  { %v1589_v49 = vpop.permute.xlu0 %1588 }
0x140f   :  { %v1808_v50 = vpop.eup %1807  ;;  %v1591_v25 = vmul.f32 %v1589_v49, %v2417_v22 }
0x1410   :  { %v1538_v51 = vmul.f32 %v1808_v50, %v1536_v41 }
0x1412   :  { %v211_v2 = vpop.permute.xlu0 %210  ;;  %1540 = vrot.lane.b32.xlu1 %v1538_v51, %s1834_s13 }
0x1413   :  { %214 = vst.msk [vmem:[%s2526_s6] sm:$0xf] %vm213_vm3, %v211_v2 }
0x1416   :  { %v603_v4 = vpop.permute.xlu0 %602 }
0x1417   :  { %1633 = vst.msk [vmem:[%s2526_s6 + $0x8] sm:$0xf] %vm213_vm3, %v603_v4 }
0x1418   :  { %1664 = vst.msk [vmem:[%s2526_s6 + $0x8] sm:$0xf] %vm222_vm1, %v2372_v56 }
0x141a   :  { %v1182_v5 = vpop.permute.xlu0 %1181 }
0x141b   :  { %1663 = vst.msk [vmem:[%s2526_s6 + $0x14] sm:$0xf] %vm213_vm3, %v1182_v5 }
0x1462   :  { %v1498_v52 = vpop.permute.xlu1 %1497 }
0x1463   :  { %v1500_v8 = vadd.f32 %v1676_v24, %v1498_v52 }
0x1465   :  { %1809 = vtanh.f32 %v1500_v8 }
0x1472   :  { %v1810_v9 = vpop.eup %1809 }
0x1473   :  { %1504 = vrot.lane.b32.xlu1 %v1810_v9, %s1835_s5 }
0x1477   :  { %1581 = vrot.lane.b32.xlu1 %v1579_v10, %s1836_s16 }
0x147b   :  { %1568 = vperm.xlu1 %1688, %v1554_v23  }
0x147f   :  { %407 = vrot.lane.b32.xlu1 %v2108_v17, %s1835_s5 }
0x1484   :  { %v1541_v56 = vpop.permute.xlu1 %1540 }
0x1485   :  { %v1543_v3 = vadd.f32 %v1541_v56, %v1513_v26 }
0x1487   :  { %1811 = vtanh.f32 %v1543_v3 }
0x1488   :  { %1813 = vpow2.f32 %v1679_v14 }
0x1494   :  { %v1812_v12 = vpop.eup %1811 }
0x1495   :  { %1547 = vrot.lane.b32.xlu1 %v1812_v12, %s1835_s5 }
0x1499   :  { %797 = vrot.lane.b32.xlu1 %v2224_v35, %s1835_s5  ;;  %v1814_v35 = vpop.eup %1813 }
0x149a   :  { %v1532_v58 = vadd.f32 1.0, %v1814_v35 }
0x149c   :  { %1815 = vrcp.f32 %v1532_v58 }
0x149d   :  { %990 = vrot.lane.b32.xlu1 %v2281_v36, %s1835_s5 }
0x14a1   :  { %1372 = vrot.lane.b32.xlu1 %v2407_v11, %s1835_s5 }
0x14a9   :  { %v1816_v42 = vpop.eup %1815 }
0x14aa   :  { %v1545_v62 = vsub.f32 1.0, %v1816_v42  ;;  %v1551_v18 = vmul.f32 %v1816_v42, %v2417_v22 }
0x14e5   :  { %v1505_v17 = vpop.permute.xlu1 %1504 }
0x14e6   :  { %v1507_v34 = vmul.f32 %v1505_v17, %v1502_v15 }
0x14e8   :  { %v1512_v53 = vadd.f32 %v1511_v16, %v1507_v34 }
0x14e9   :  { %v1582_v55 = vpop.permute.xlu1 %1581 }
0x14ea   :  { %v1560_v54 = vmul.f32 %v1558_v46, %v1512_v53 }
0x14ec   :  { %v1584_v57 = vadd.f32 %v1582_v55, %v1560_v54 }
0x14ee   :  { %1594 = vrot.lane.b32.xlu0 %v1584_v57, %s1835_s5 }
0x14f2   :  { %1562 = vrot.lane.b32.xlu0 %v1560_v54, %s1835_s5 }
0x14f6   :  { %v1569_v36 = vpop.permute.xlu1 %1568 }
0x14fa   :  { %v408_v11 = vpop.permute.xlu1 %407 }
0x14fb   :  { %1623 = vst.msk [vmem:[%s2526_s6 + $0x4] sm:$0xf] %vm213_vm3, %v408_v11 }
0x14fc   :  { %1674 = vst.msk [vmem:[%s2526_s6 + $0x4] sm:$0xf] %vm222_vm1, %v2412_v6 }
0x1507   :  { %v1548_v63 = vpop.permute.xlu1 %1547 }
0x1508   :  { %v1550_v19 = vmul.f32 %v1548_v63, %v1545_v62 }
0x150a   :  { %v1552_v20 = vadd.f32 %v1551_v18, %v1550_v19 }
0x150b   :  { %v798_v21 = vpop.permute.xlu1 %797 }
0x150c   :  { %v1571_v27 = vmul.f32 %v1569_v36, %v1552_v20  ;;  %1643 = vst.msk [vmem:[%s2526_s6 + $0xc] sm:$0xf] %vm213_vm3, %v798_v21 }
0x150d   :  { %1654 = vst.msk [vmem:[%s2526_s6 + $0xc] sm:$0xf] %vm222_vm1, %v2286_v1 }
0x150e   :  { %1572 = vst.msk [vmem:[%s2526_s6] sm:$0xf] %vm222_vm1, %v1571_v27  ;;  %v1592_v6 = vadd.f32 %v1591_v25, %v1571_v27 }
0x150f   :  { %v991_v28 = vpop.permute.xlu1 %990 }
0x1510   :  { %1653 = vst.msk [vmem:[%s2526_s6 + $0x10] sm:$0xf] %vm213_vm3, %v991_v28 }
0x1513   :  { %v1373_v22 = vpop.permute.xlu1 %1372 }
0x1514   :  { %1673 = vst.msk [vmem:[%s2526_s6 + $0x18] sm:$0xf] %vm213_vm3, %v1373_v22 }
0x1560   :  { %v1595_v1 = vpop.permute.xlu0 %1594 }
0x1561   :  { %v1597_v61 = vsel %vm248_vm2, %v1595_v1, %v1592_v6 }
0x1562   :  { %1599 = vst.msk [vmem:[%s2527_s7] sm:$0xf] %vm1598_vm4, %v1597_v61 }
0x1564   :  { %v1563_v29 = vpop.permute.xlu0 %1562 }
0x1565   :  { %1681 = vst.msk [vmem:[%s2526_s6 + $0x1c] sm:$0xf] %vm213_vm3, %v1563_v29 }

</bundles_post_ra>
